<compile_context>
chip_gen: v5e
topology: v5e:2x2
jax: 0.10.0
libtpu: 0.0.40
codegen_flags: <defaults>
</compile_context>

<pallas_src>
import functools

import jax
import jax.numpy as jnp
from jax import lax
from jax.experimental import pallas as pl
from jax.experimental.pallas import tpu as pltpu

D = 768        # embedding width, fixed by the module
LANE = 128     # TPU lane width


# ---------------------------------------------------------------------------
# Small-table path: whole embedding table resident in VMEM.
# ---------------------------------------------------------------------------
def _vmem_score_kernel(q_ref, idx_ref, cnt_ref, emb_ref, out_ref):
    """One grid step = one TB-row batch tile; table lives fully in VMEM.

    q_ref   : VMEM (TB, D)         query tile
    idx_ref : VMEM (TB, all_node)  int32 candidate row ids (clamped in wrapper)
    cnt_ref : VMEM (TB, 1)         int32 number of real candidates per row
    emb_ref : VMEM (vocab, D)      full embedding table (constant block index)
    out_ref : VMEM (TB, ALLN_P)    scores tile (lane-dense, padded to 128)
    """
    tb = q_ref.shape[0]
    vocab = emb_ref.shape[0]
    alln_p = out_ref.shape[1]
    all_node = idx_ref.shape[1]

    q = q_ref[...].astype(jnp.float32)
    emb = emb_ref[...].astype(jnp.float32)
    # (TB, vocab) similarities against the whole table on the MXU, then pick the
    # candidate columns with a lane mask (no dynamic gather needed).
    sim = lax.dot_general(q, emb, (((1,), (1,)), ((), ())),
                          preferred_element_type=jnp.float32)

    vlane = lax.broadcasted_iota(jnp.int32, (tb, vocab), 1)
    olane = lax.broadcasted_iota(jnp.int32, (tb, alln_p), 1)
    scores = jnp.zeros((tb, alln_p), jnp.float32)
    for n in range(all_node):                      # static unroll, all_node small
        col = idx_ref[:, n:n + 1]                  # (TB, 1) int32
        s_n = jnp.sum(jnp.where(vlane == col, sim, 0.0), axis=-1, keepdims=True)
        scores = jnp.where(olane == n, s_n, scores)
    # Exact zeros for padded candidate slots (PyTorch cats torch.zeros).
    out_ref[...] = jnp.where(olane < cnt_ref[...], scores, 0.0)


# ---------------------------------------------------------------------------
# Large-table path: HBM-resident table, manual double-buffered row gather.
# ---------------------------------------------------------------------------
def _hbm_score_kernel(idx_ref, q_ref, cnt_ref, emb_hbm, out_ref, child_ref, sem,
                      *, packed_bf16):
    """One grid step = one TB-row batch tile.

    idx_ref  : SMEM (batch_p*all_node,) int32 flat candidate ids (scalar prefetch)
    q_ref    : VMEM (TB, D)        query tile
    cnt_ref  : VMEM (TB, 1)        int32 real-candidate count per row
    emb_hbm  : ANY  (vocab, W)     embedding table (W=D, or D//2 if bf16-packed)
    out_ref  : VMEM (TB, ALLN_P)   scores tile (lane-dense)
    child_ref: VMEM (2*TB*all_node, W) double-buffered gathered rows,
               candidate-major: row slot*ROWS + n*TB + b holds candidate n of
               local batch row b, so each candidate slot is a contiguous (TB, W)
               block for the VPU multiply-reduce.
    sem      : DMA semaphores, one per buffer slot.
    """
    tb = q_ref.shape[0]
    alln_p = out_ref.shape[1]
    rows = child_ref.shape[0] // 2               # TB * all_node per buffer slot
    all_node = rows // tb

    g = pl.program_id(0)                         # core-split index
    j = pl.program_id(1)                         # tile index within this core
    nj = pl.num_programs(1)
    t = g * nj + j                               # global batch-tile index
    slot = j % 2

    def start_fetch(tile, to_slot):
        base = tile * (tb * all_node)            # flat offset of this tile's ids
        dst0 = to_slot * rows
        # Statically unrolled issue loop (all_node, tb are compile-time): the
        # scalar index math co-issues on the scalar slots and descriptor pushes
        # pack back-to-back on the misc slot.
        for n in range(all_node):
            for b in range(tb):
                row = idx_ref[base + b * all_node + n]
                pltpu.make_async_copy(
                    emb_hbm.at[pl.ds(row, 1), :],
                    child_ref.at[pl.ds(dst0 + n * tb + b, 1), :],
                    sem.at[to_slot],
                ).start()

    def wait_fetch(of_slot):
        # ONE aggregate wait per buffer slot: every row copy for this slot
        # targets sem[of_slot]; DMA semaphores count bytes, and the descriptor
        # below covers exactly rows*W*itemsize bytes == the sum of the issued
        # (1, W) copies, so a single wait covers them all.
        full = child_ref.at[pl.ds(of_slot * rows, rows), :]
        pltpu.make_async_copy(full, full, sem.at[of_slot]).wait()

    # Prime the pipeline on the first tile of this core's range.
    @pl.when(j == 0)
    def _():
        start_fetch(t, slot)

    # Issue the NEXT tile's gather into the other buffer BEFORE waiting on the
    # current one (different buffer + semaphore, so it is safe): descriptor
    # issue and SMEM id reads overlap with the in-flight DMAs' completion.
    @pl.when(j + 1 < nj)
    def _():
        start_fetch(t + 1, 1 - slot)

    wait_fetch(slot)

    # ---- scores on the VPU: broadcast-multiply + lane reduction -------------
    q = q_ref[...].astype(jnp.float32)
    olane = lax.broadcasted_iota(jnp.int32, (tb, alln_p), 1)
    scores = jnp.zeros((tb, alln_p), jnp.float32)
    for n in range(all_node):                    # static unroll (small all_node)
        start = pl.multiple_of(slot * rows + n * tb, 8)
        w = child_ref[pl.ds(start, tb), :]       # (TB, W)
        if packed_bf16:
            # Word k of a row packs (c[k], c[k + D/2]) as bf16 in (lo, hi) bits.
            half = q.shape[1] // 2
            lo = pltpu.bitcast(w << 16, jnp.float32)                     # dims [0, D/2)
            hi = pltpu.bitcast(w & jnp.uint32(0xFFFF0000), jnp.float32)  # dims [D/2, D)
            s_n = jnp.sum(q[:, :half] * lo + q[:, half:] * hi,
                          axis=-1, keepdims=True)                        # (TB, 1)
        else:
            s_n = jnp.sum(q * w.astype(jnp.float32), axis=-1, keepdims=True)
        scores = jnp.where(olane == n, s_n, scores)
    # Exact zeros past the real candidates (PyTorch cats torch.zeros).
    out_ref[...] = jnp.where(olane < cnt_ref[...], scores, 0.0)


# ---------------------------------------------------------------------------
# Wrapper
# ---------------------------------------------------------------------------
def embedding_scores(query_embeddings, emb_table, cand_idx, valid_counts, *,
                     tile_batch=64, core_split=1, core_parallel=False,
                     gather_dtype=None, force_hbm=False,
                     vmem_table_budget=8 << 20):
    """scores[b, k] = <query[b], emb_table[cand_idx[b, k]]> for k < valid_counts[b], else 0.

    tile_batch   : batch rows per grid step; multiple of 8 (16 for bf16 queries).
                   64-128 recommended so per-step fixed cost and DMA setup are
                   amortized against the gathered bytes.
    core_split / core_parallel :
                   On v7x pass core_split=2, core_parallel=True (HBM path) to
                   shard batch tiles across the two TensorCores with
                   pltpu.CORE_PARALLEL.  Keep core_split=1 on v5e/v6e.
    gather_dtype : jnp.bfloat16 halves HBM gather bytes and gather scratch
                   (rows are packed 2xbf16 per uint32 word so DMAs stay on
                   32-bit granularity); None keeps emb_table.dtype.
    vmem_table_budget : if the (cast) table fits in this many bytes it is staged
                   whole in VMEM and the per-row DMA machinery is skipped.
    VMEM sizing  : HBM-path gather scratch is 2*tile_batch*all_node*D*itemsize
                   bytes; keep the resulting limit below ~48 MiB on v7x (64 MiB
                   physical VMEM), up to ~96 MiB is fine on v5e/v6e.
    """
    batch, d = query_embeddings.shape
    vocab, d2 = emb_table.shape
    assert d == D and d2 == D, "embedding width is fixed at 768 by the module"
    all_node = cand_idx.shape[1]
    assert all_node >= 1

    sublane = 16 if query_embeddings.dtype == jnp.bfloat16 else 8
    assert tile_batch % sublane == 0, (
        f"tile_batch must be a multiple of {sublane} for {query_embeddings.dtype} queries")
    core_split = max(int(core_split), 1)

    gdtype = emb_table.dtype if gather_dtype is None else jnp.dtype(gather_dtype)
    assert jnp.dtype(gdtype).itemsize == 4 or jnp.dtype(gdtype) == jnp.dtype(jnp.bfloat16), (
        "gather_dtype must be a 32-bit dtype or bfloat16")

    alln_p = pl.cdiv(all_node, LANE) * LANE          # lane-dense output width
    chunk = tile_batch * core_split
    batch_p = pl.cdiv(batch, chunk) * chunk
    num_tiles = batch_p // tile_batch
    tiles_per_core = num_tiles // core_split
    pad_b = batch_p - batch

    q_p = jnp.pad(query_embeddings, ((0, pad_b), (0, 0)))
    # Clamp so no gather (DMA or VMEM lane-select) can ever go out of bounds;
    # padded rows / padded candidate slots resolve to row 0 and are masked to
    # exact zero in the kernel.
    idx_p = jnp.pad(jnp.clip(cand_idx.astype(jnp.int32), 0, vocab - 1),
                    ((0, pad_b), (0, 0)))
    cnt_p = jnp.pad(valid_counts.astype(jnp.int32).reshape(-1, 1),
                    ((0, pad_b), (0, 0)))

    out_shape = jax.ShapeDtypeStruct((batch_p, alln_p), jnp.float32)
    table_bytes = vocab * d * jnp.dtype(gdtype).itemsize

    # ---------------- small-table fast path (table resident in VMEM) --------
    if not force_hbm and table_bytes <= vmem_table_budget:
        out = pl.pallas_call(
            _vmem_score_kernel,
            out_shape=out_shape,
            grid=(num_tiles,),
            in_specs=[
                pl.BlockSpec((tile_batch, d), lambda i: (i, 0)),
                pl.BlockSpec((tile_batch, all_node), lambda i: (i, 0)),
                pl.BlockSpec((tile_batch, 1), lambda i: (i, 0)),
                pl.BlockSpec((vocab, d), lambda i: (0, 0)),     # fetched once
            ],
            out_specs=pl.BlockSpec((tile_batch, alln_p), lambda i: (i, 0)),
            compiler_params=pltpu.CompilerParams(
                dimension_semantics=(pltpu.ARBITRARY,),
                vmem_limit_bytes=int(min(100 << 20,
                                         max(32 << 20, 2 * table_bytes + (16 << 20)))),
            ),
        )(q_p, idx_p, cnt_p, emb_table.astype(gdtype))
        return out[:batch, :all_node]

    # ---------------- large-table path (HBM-resident table) -----------------
    packed_bf16 = jnp.dtype(gdtype) == jnp.dtype(jnp.bfloat16)
    if packed_bf16:
        # bf16 gather: pack dims (i, i + D/2) of every row into one uint32 so
        # each per-row DMA works on plain 32-bit words (single logical rows of a
        # sublane-packed bf16 VMEM buffer are not DMA-friendly).
        emb_bf16 = emb_table.astype(jnp.bfloat16)
        lo_bits = lax.bitcast_convert_type(emb_bf16[:, : d // 2], jnp.uint16).astype(jnp.uint32)
        hi_bits = lax.bitcast_convert_type(emb_bf16[:, d // 2:], jnp.uint16).astype(jnp.uint32)
        emb_gather = lo_bits | (hi_bits << 16)          # (vocab, D//2) uint32
        gather_width, gather_itemsize, scratch_dtype = d // 2, 4, jnp.uint32
    else:
        emb_gather = emb_table.astype(gdtype)
        gather_width, gather_itemsize, scratch_dtype = d, jnp.dtype(gdtype).itemsize, gdtype

    # Whole index array goes to SMEM via scalar prefetch: the cross-tile
    # prefetch (tile t+1 issued while tile t computes) must read the NEXT
    # tile's ids, which a per-tile SMEM block cannot provide.  1-D SMEM pads to
    # next_pow2(4N) bytes, so guard the budget.
    idx_flat = idx_p.reshape(-1)
    assert idx_flat.size * 4 <= (512 << 10), (
        "candidate-id table too large for SMEM scalar prefetch; split the batch "
        "across multiple embedding_scores calls")

    scratch_bytes = 2 * tile_batch * all_node * gather_width * gather_itemsize
    io_bytes = 4 * tile_batch * (d * q_p.dtype.itemsize + alln_p * 4 + 4)
    vmem_limit = int(min(96 << 20, max(32 << 20, scratch_bytes + io_bytes + (8 << 20))))

    tile_map = lambda g, j, idx: (g * tiles_per_core + j, 0)
    outer_sem = pltpu.CORE_PARALLEL if core_parallel else pltpu.ARBITRARY

    grid_spec = pltpu.PrefetchScalarGridSpec(
        num_scalar_prefetch=1,                              # idx_flat -> SMEM
        grid=(core_split, tiles_per_core),
        in_specs=[
            pl.BlockSpec((tile_batch, d), tile_map),        # queries (batch-tiled)
            pl.BlockSpec((tile_batch, 1), tile_map),        # valid counts
            pl.BlockSpec(memory_space=pl.ANY),              # table stays in HBM
        ],
        out_specs=pl.BlockSpec((tile_batch, alln_p), tile_map),
        scratch_shapes=[
            pltpu.VMEM((2 * tile_batch * all_node, gather_width), scratch_dtype),
            pltpu.SemaphoreType.DMA((2,)),
        ],
    )

    out = pl.pallas_call(
        functools.partial(_hbm_score_kernel, packed_bf16=packed_bf16),
        out_shape=out_shape,
        grid_spec=grid_spec,
        compiler_params=pltpu.CompilerParams(
            dimension_semantics=(outer_sem, pltpu.ARBITRARY),
            vmem_limit_bytes=vmem_limit,
        ),
    )(idx_flat, q_p, cnt_p, emb_gather)
    return out[:batch, :all_node]


# ---------------------------------------------------------------------------
# Demo / self-test
# ---------------------------------------------------------------------------
if __name__ == "__main__":
    batch = 20        # not a multiple of the tile -> exercises batch padding
    vocab = 64        # number of node embeddings in the (synthetic) table
    all_node = 8      # candidates per query (positive + negatives, zero-padded)

    key = jax.random.PRNGKey(0)
    k_emb, k_q, k_idx = jax.random.split(key, 3)

    # Deterministic synthetic "pretrained" node embeddings and queries.
    emb_table = jax.random.normal(k_emb, (vocab, D), dtype=jnp.float32)
    query_embeddings = jax.random.normal(k_q, (batch, D), dtype=jnp.float32)

    # Deterministic candidate indices (stand-in for label_offest lookups +
    # sibling / random.sample negative mining done host-side in PyTorch).
    cand_idx = jax.random.randint(k_idx, (batch, all_node), 0, vocab).astype(jnp.int32)

    # Some rows have fewer real candidates -> exercises the zero-padding branch.
    valid_counts = jnp.where(jnp.arange(batch) % 3 == 0, all_node - 3, all_node)
    valid_mask = jnp.arange(all_node)[None, :] < valid_counts[:, None]

    # Plain-JAX references (HIGHEST precision -> ~exact f32).
    children = emb_table[cand_idx]                                     # (batch, all_node, D)
    ref = jnp.einsum("bd,bnd->bn", query_embeddings, children,
                     precision=lax.Precision.HIGHEST)
    ref = jnp.where(valid_mask, ref, 0.0)
    children_bf16 = emb_table.astype(jnp.bfloat16).astype(jnp.float32)[cand_idx]
    ref_bf16 = jnp.einsum("bd,bnd->bn", query_embeddings, children_bf16,
                          precision=lax.Precision.HIGHEST)
    ref_bf16 = jnp.where(valid_mask, ref_bf16, 0.0)

    # 1) Small-table fast path (whole table in VMEM, MXU scoring).  The MXU may
    #    use default (bf16-pass) precision on f32 operands -> loose tolerance.
    s_vmem = jax.block_until_ready(
        embedding_scores(query_embeddings, emb_table, cand_idx, valid_counts))
    assert s_vmem.shape == (batch, all_node)
    assert jnp.allclose(s_vmem, ref, rtol=2e-2, atol=0.5), (
        f"VMEM path max abs err {jnp.max(jnp.abs(s_vmem - ref))}")

    # 2) HBM gather path, f32 (forced).  tile_batch=16 keeps the fully unrolled
    #    DMA-issue code short AND gives >1 tile so the demo actually runs the
    #    double-buffered prime/prefetch/wait pipeline; use the default 64-128
    #    tile in production.
    s_hbm = jax.block_until_ready(
        embedding_scores(query_embeddings, emb_table, cand_idx, valid_counts,
                         force_hbm=True, tile_batch=16))
    assert jnp.allclose(s_hbm, ref, rtol=1e-4, atol=1e-2), (
        f"HBM path max abs err {jnp.max(jnp.abs(s_hbm - ref))}")

    # 3) HBM gather path with bf16 gather (halved HBM bytes / gather scratch).
    s_bf16 = jax.block_until_ready(
        embedding_scores(query_embeddings, emb_table, cand_idx, valid_counts,
                         force_hbm=True, tile_batch=16,
                         gather_dtype=jnp.bfloat16))
    assert jnp.allclose(s_bf16, ref_bf16, rtol=1e-3, atol=2e-2), (
        f"HBM bf16 path max abs err {jnp.max(jnp.abs(s_bf16 - ref_bf16))}")

    print("KERNEL_OK")
</pallas_src>

<mosaic_0001>
module attributes {stable_mosaic.version = 11 : i64} {
  func.func @_vmem_score_kernel(%arg0: i32, %arg1: memref<64x768xf32, #tpu.memory_space<vmem>>, %arg2: memref<64x8xi32, #tpu.memory_space<vmem>>, %arg3: memref<64x1xi32, #tpu.memory_space<vmem>>, %arg4: memref<64x768xf32, #tpu.memory_space<vmem>>, %arg5: memref<64x128xf32, #tpu.memory_space<vmem>>) attributes {dimension_semantics = [#tpu.dimension_semantics<arbitrary>], iteration_bounds = array<i64: 1>, scalar_prefetch = 0 : i64, scratch_operands = 0 : i64, tpu.core_type = #tpu.core_type<tc>, window_params = [{transform_indices = @transform_0, window_bounds = array<i64: 64, 768>}, {transform_indices = @transform_1, window_bounds = array<i64: 64, 8>}, {transform_indices = @transform_2, window_bounds = array<i64: 64, 1>}, {pipeline_mode = #tpu.pipeline_mode<synchronous>, transform_indices = @transform_3, window_bounds = array<i64: 64, 768>}, {transform_indices = @transform_4, window_bounds = array<i64: 64, 128>}]} {
    %c0 = arith.constant 0 : index
    %c0_0 = arith.constant 0 : index
    %0 = vector.load %arg1[%c0, %c0_0] : memref<64x768xf32, #tpu.memory_space<vmem>>, vector<64x768xf32>
    %c0_1 = arith.constant 0 : index
    %c0_2 = arith.constant 0 : index
    %1 = vector.load %arg4[%c0_1, %c0_2] : memref<64x768xf32, #tpu.memory_space<vmem>>, vector<64x768xf32>
    %cst = arith.constant dense<0.000000e+00> : vector<64x64xf32>
    %2 = tpu.matmul %0, %1, %cst {dimension_numbers = #tpu.dot_dimension_numbers<[1], [1], [0], [0], [0, 0, 1, 0], [], []>} : vector<64x768xf32>, vector<64x768xf32>, vector<64x64xf32> -> vector<64x64xf32>
    %3 = tpu.iota {dimensions = array<i32: 1>} : vector<64x64xi32>
    %4 = tpu.iota {dimensions = array<i32: 1>} : vector<64x128xi32>
    %cst_3 = arith.constant 0.000000e+00 : f32
    %5 = vector.broadcast %cst_3 : f32 to vector<64x128xf32>
    %c0_4 = arith.constant 0 : index
    %c0_5 = arith.constant 0 : index
    %6 = vector.load %arg2[%c0_4, %c0_5] : memref<64x8xi32, #tpu.memory_space<vmem>>, vector<64x1xi32>
    %7 = vector.broadcast %6 : vector<64x1xi32> to vector<64x64xi32>
    %8 = arith.cmpi eq, %3, %7 : vector<64x64xi32>
    %cst_6 = arith.constant 0.000000e+00 : f32
    %9 = vector.broadcast %cst_6 : f32 to vector<64x64xf32>
    %10 = arith.select %8, %2, %9 : vector<64x64xi1>, vector<64x64xf32>
    %cst_7 = arith.constant dense<0.000000e+00> : vector<64xf32>
    %11 = vector.multi_reduction <add>, %10, %cst_7 [1] : vector<64x64xf32> to vector<64xf32>
    %12 = vector.shape_cast %11 : vector<64xf32> to vector<64x1xf32>
    %c0_i32 = arith.constant 0 : i32
    %13 = vector.broadcast %c0_i32 : i32 to vector<64x128xi32>
    %14 = arith.cmpi eq, %4, %13 : vector<64x128xi32>
    %15 = vector.shape_cast %12 : vector<64x1xf32> to vector<64x1xf32>
    %16 = vector.broadcast %15 : vector<64x1xf32> to vector<64x128xf32>
    %17 = arith.select %14, %16, %5 : vector<64x128xi1>, vector<64x128xf32>
    %c0_8 = arith.constant 0 : index
    %c1 = arith.constant 1 : index
    %18 = vector.load %arg2[%c0_8, %c1] : memref<64x8xi32, #tpu.memory_space<vmem>>, vector<64x1xi32>
    %19 = vector.broadcast %18 : vector<64x1xi32> to vector<64x64xi32>
    %20 = arith.cmpi eq, %3, %19 : vector<64x64xi32>
    %cst_9 = arith.constant 0.000000e+00 : f32
    %21 = vector.broadcast %cst_9 : f32 to vector<64x64xf32>
    %22 = arith.select %20, %2, %21 : vector<64x64xi1>, vector<64x64xf32>
    %cst_10 = arith.constant dense<0.000000e+00> : vector<64xf32>
    %23 = vector.multi_reduction <add>, %22, %cst_10 [1] : vector<64x64xf32> to vector<64xf32>
    %24 = vector.shape_cast %23 : vector<64xf32> to vector<64x1xf32>
    %c1_i32 = arith.constant 1 : i32
    %25 = vector.broadcast %c1_i32 : i32 to vector<64x128xi32>
    %26 = arith.cmpi eq, %4, %25 : vector<64x128xi32>
    %27 = vector.shape_cast %24 : vector<64x1xf32> to vector<64x1xf32>
    %28 = vector.broadcast %27 : vector<64x1xf32> to vector<64x128xf32>
    %29 = arith.select %26, %28, %17 : vector<64x128xi1>, vector<64x128xf32>
    %c0_11 = arith.constant 0 : index
    %c2 = arith.constant 2 : index
    %30 = vector.load %arg2[%c0_11, %c2] : memref<64x8xi32, #tpu.memory_space<vmem>>, vector<64x1xi32>
    %31 = vector.broadcast %30 : vector<64x1xi32> to vector<64x64xi32>
    %32 = arith.cmpi eq, %3, %31 : vector<64x64xi32>
    %cst_12 = arith.constant 0.000000e+00 : f32
    %33 = vector.broadcast %cst_12 : f32 to vector<64x64xf32>
    %34 = arith.select %32, %2, %33 : vector<64x64xi1>, vector<64x64xf32>
    %cst_13 = arith.constant dense<0.000000e+00> : vector<64xf32>
    %35 = vector.multi_reduction <add>, %34, %cst_13 [1] : vector<64x64xf32> to vector<64xf32>
    %36 = vector.shape_cast %35 : vector<64xf32> to vector<64x1xf32>
    %c2_i32 = arith.constant 2 : i32
    %37 = vector.broadcast %c2_i32 : i32 to vector<64x128xi32>
    %38 = arith.cmpi eq, %4, %37 : vector<64x128xi32>
    %39 = vector.shape_cast %36 : vector<64x1xf32> to vector<64x1xf32>
    %40 = vector.broadcast %39 : vector<64x1xf32> to vector<64x128xf32>
    %41 = arith.select %38, %40, %29 : vector<64x128xi1>, vector<64x128xf32>
    %c0_14 = arith.constant 0 : index
    %c3 = arith.constant 3 : index
    %42 = vector.load %arg2[%c0_14, %c3] : memref<64x8xi32, #tpu.memory_space<vmem>>, vector<64x1xi32>
    %43 = vector.broadcast %42 : vector<64x1xi32> to vector<64x64xi32>
    %44 = arith.cmpi eq, %3, %43 : vector<64x64xi32>
    %cst_15 = arith.constant 0.000000e+00 : f32
    %45 = vector.broadcast %cst_15 : f32 to vector<64x64xf32>
    %46 = arith.select %44, %2, %45 : vector<64x64xi1>, vector<64x64xf32>
    %cst_16 = arith.constant dense<0.000000e+00> : vector<64xf32>
    %47 = vector.multi_reduction <add>, %46, %cst_16 [1] : vector<64x64xf32> to vector<64xf32>
    %48 = vector.shape_cast %47 : vector<64xf32> to vector<64x1xf32>
    %c3_i32 = arith.constant 3 : i32
    %49 = vector.broadcast %c3_i32 : i32 to vector<64x128xi32>
    %50 = arith.cmpi eq, %4, %49 : vector<64x128xi32>
    %51 = vector.shape_cast %48 : vector<64x1xf32> to vector<64x1xf32>
    %52 = vector.broadcast %51 : vector<64x1xf32> to vector<64x128xf32>
    %53 = arith.select %50, %52, %41 : vector<64x128xi1>, vector<64x128xf32>
    %c0_17 = arith.constant 0 : index
    %c4 = arith.constant 4 : index
    %54 = vector.load %arg2[%c0_17, %c4] : memref<64x8xi32, #tpu.memory_space<vmem>>, vector<64x1xi32>
    %55 = vector.broadcast %54 : vector<64x1xi32> to vector<64x64xi32>
    %56 = arith.cmpi eq, %3, %55 : vector<64x64xi32>
    %cst_18 = arith.constant 0.000000e+00 : f32
    %57 = vector.broadcast %cst_18 : f32 to vector<64x64xf32>
    %58 = arith.select %56, %2, %57 : vector<64x64xi1>, vector<64x64xf32>
    %cst_19 = arith.constant dense<0.000000e+00> : vector<64xf32>
    %59 = vector.multi_reduction <add>, %58, %cst_19 [1] : vector<64x64xf32> to vector<64xf32>
    %60 = vector.shape_cast %59 : vector<64xf32> to vector<64x1xf32>
    %c4_i32 = arith.constant 4 : i32
    %61 = vector.broadcast %c4_i32 : i32 to vector<64x128xi32>
    %62 = arith.cmpi eq, %4, %61 : vector<64x128xi32>
    %63 = vector.shape_cast %60 : vector<64x1xf32> to vector<64x1xf32>
    %64 = vector.broadcast %63 : vector<64x1xf32> to vector<64x128xf32>
    %65 = arith.select %62, %64, %53 : vector<64x128xi1>, vector<64x128xf32>
    %c0_20 = arith.constant 0 : index
    %c5 = arith.constant 5 : index
    %66 = vector.load %arg2[%c0_20, %c5] : memref<64x8xi32, #tpu.memory_space<vmem>>, vector<64x1xi32>
    %67 = vector.broadcast %66 : vector<64x1xi32> to vector<64x64xi32>
    %68 = arith.cmpi eq, %3, %67 : vector<64x64xi32>
    %cst_21 = arith.constant 0.000000e+00 : f32
    %69 = vector.broadcast %cst_21 : f32 to vector<64x64xf32>
    %70 = arith.select %68, %2, %69 : vector<64x64xi1>, vector<64x64xf32>
    %cst_22 = arith.constant dense<0.000000e+00> : vector<64xf32>
    %71 = vector.multi_reduction <add>, %70, %cst_22 [1] : vector<64x64xf32> to vector<64xf32>
    %72 = vector.shape_cast %71 : vector<64xf32> to vector<64x1xf32>
    %c5_i32 = arith.constant 5 : i32
    %73 = vector.broadcast %c5_i32 : i32 to vector<64x128xi32>
    %74 = arith.cmpi eq, %4, %73 : vector<64x128xi32>
    %75 = vector.shape_cast %72 : vector<64x1xf32> to vector<64x1xf32>
    %76 = vector.broadcast %75 : vector<64x1xf32> to vector<64x128xf32>
    %77 = arith.select %74, %76, %65 : vector<64x128xi1>, vector<64x128xf32>
    %c0_23 = arith.constant 0 : index
    %c6 = arith.constant 6 : index
    %78 = vector.load %arg2[%c0_23, %c6] : memref<64x8xi32, #tpu.memory_space<vmem>>, vector<64x1xi32>
    %79 = vector.broadcast %78 : vector<64x1xi32> to vector<64x64xi32>
    %80 = arith.cmpi eq, %3, %79 : vector<64x64xi32>
    %cst_24 = arith.constant 0.000000e+00 : f32
    %81 = vector.broadcast %cst_24 : f32 to vector<64x64xf32>
    %82 = arith.select %80, %2, %81 : vector<64x64xi1>, vector<64x64xf32>
    %cst_25 = arith.constant dense<0.000000e+00> : vector<64xf32>
    %83 = vector.multi_reduction <add>, %82, %cst_25 [1] : vector<64x64xf32> to vector<64xf32>
    %84 = vector.shape_cast %83 : vector<64xf32> to vector<64x1xf32>
    %c6_i32 = arith.constant 6 : i32
    %85 = vector.broadcast %c6_i32 : i32 to vector<64x128xi32>
    %86 = arith.cmpi eq, %4, %85 : vector<64x128xi32>
    %87 = vector.shape_cast %84 : vector<64x1xf32> to vector<64x1xf32>
    %88 = vector.broadcast %87 : vector<64x1xf32> to vector<64x128xf32>
    %89 = arith.select %86, %88, %77 : vector<64x128xi1>, vector<64x128xf32>
    %c0_26 = arith.constant 0 : index
    %c7 = arith.constant 7 : index
    %90 = vector.load %arg2[%c0_26, %c7] : memref<64x8xi32, #tpu.memory_space<vmem>>, vector<64x1xi32>
    %91 = vector.broadcast %90 : vector<64x1xi32> to vector<64x64xi32>
    %92 = arith.cmpi eq, %3, %91 : vector<64x64xi32>
    %cst_27 = arith.constant 0.000000e+00 : f32
    %93 = vector.broadcast %cst_27 : f32 to vector<64x64xf32>
    %94 = arith.select %92, %2, %93 : vector<64x64xi1>, vector<64x64xf32>
    %cst_28 = arith.constant dense<0.000000e+00> : vector<64xf32>
    %95 = vector.multi_reduction <add>, %94, %cst_28 [1] : vector<64x64xf32> to vector<64xf32>
    %96 = vector.shape_cast %95 : vector<64xf32> to vector<64x1xf32>
    %c7_i32 = arith.constant 7 : i32
    %97 = vector.broadcast %c7_i32 : i32 to vector<64x128xi32>
    %98 = arith.cmpi eq, %4, %97 : vector<64x128xi32>
    %99 = vector.shape_cast %96 : vector<64x1xf32> to vector<64x1xf32>
    %100 = vector.broadcast %99 : vector<64x1xf32> to vector<64x128xf32>
    %101 = arith.select %98, %100, %89 : vector<64x128xi1>, vector<64x128xf32>
    %c0_29 = arith.constant 0 : index
    %c0_30 = arith.constant 0 : index
    %102 = vector.load %arg3[%c0_29, %c0_30] : memref<64x1xi32, #tpu.memory_space<vmem>>, vector<64x1xi32>
    %103 = vector.broadcast %102 : vector<64x1xi32> to vector<64x128xi32>
    %104 = arith.cmpi slt, %4, %103 : vector<64x128xi32>
    %cst_31 = arith.constant 0.000000e+00 : f32
    %105 = vector.broadcast %cst_31 : f32 to vector<64x128xf32>
    %106 = arith.select %104, %101, %105 : vector<64x128xi1>, vector<64x128xf32>
    %c0_32 = arith.constant 0 : index
    %c0_33 = arith.constant 0 : index
    %107 = vector.load %arg5[%c0_32, %c0_33] : memref<64x128xf32, #tpu.memory_space<vmem>>, vector<64x128xf32>
    tpu.vector_store %arg5[%c0_32, %c0_33], %106 {strides = array<i32>} : memref<64x128xf32, #tpu.memory_space<vmem>>, vector<64x128xf32>,
    return
  }
  func.func @transform_0(%arg0: i32) -> (i32, i32) {
    %c0_i32 = arith.constant 0 : i32
    %c0_i32_0 = arith.constant 0 : i32
    return %arg0, %c0_i32 : i32, i32
  }
  func.func @transform_1(%arg0: i32) -> (i32, i32) {
    %c0_i32 = arith.constant 0 : i32
    %c0_i32_0 = arith.constant 0 : i32
    return %arg0, %c0_i32 : i32, i32
  }
  func.func @transform_2(%arg0: i32) -> (i32, i32) {
    %c0_i32 = arith.constant 0 : i32
    %c0_i32_0 = arith.constant 0 : i32
    return %arg0, %c0_i32 : i32, i32
  }
  func.func @transform_3(%arg0: i32) -> (i32, i32) {
    %c0_i32 = arith.constant 0 : i32
    %c0_i32_0 = arith.constant 0 : i32
    %c0_i32_1 = arith.constant 0 : i32
    return %c0_i32, %c0_i32_0 : i32, i32
  }
  func.func @transform_4(%arg0: i32) -> (i32, i32) {
    %c0_i32 = arith.constant 0 : i32
    %c0_i32_0 = arith.constant 0 : i32
    return %arg0, %c0_i32 : i32, i32
  }
}

</mosaic_0001>

<bundles_post_ra>
// kernel: tpu_custom_call.1
= control target key start
LH: loop header
LB: loop body
LE: loop exit
PB: predicated region body
PF: predicated region fallthrough
CT: control target
= control target key end

     0   :  { %9 = vsyncpa [#allocation3], 0  ;;  %s1973_s0 = inlined_call_operand.hbm [shape: f32[64,768], index: 0, kind: input, shape index: {}]   ;;  %s1974_s1 = inlined_call_operand.vmem [shape: s32[64,8], index: 1, kind: input, shape index: {}]   ;;  %s1975_s2 = inlined_call_operand.vmem [shape: s32[64,1], index: 2, kind: input, shape index: {}]   ;;  %s1976_s3 = inlined_call_operand.hbm [shape: f32[64,768], index: 3, kind: input, shape index: {}]   ;;  %s1977_s4 = inlined_call_operand.hbm [shape: f32[64,128], index: 4, kind: output, shape index: {}]  }
   0x1   :  { %10 = vsyncpa [#allocation6], 0 }
   0x2   :  { %11 = vsyncpa [#allocation4], 0  ;;  %s16_s17 = sshll.u32 %s1973_s0, 4  ;;  %s1207_s18 = smov [#allocation2]   ;;  %s17_s17 = int_to_ptr.hbm [resolvable:$true] %s16_s17 }
   0x3   :  { %s18_s19 = sshll.u32 %s1207_s18, 4  ;;  %s33_s22 = sshll.u32 %s1976_s3, 4  ;;  %s19_s19 = int_to_ptr.vmem [resolvable:$true] %s18_s19  ;;  %s34_s22 = int_to_ptr.hbm [resolvable:$true] %s33_s22 }
   0x4   :  { %s1208_s23 = smov 768   ;;  %s1209_s24 = smov 48  }
   0x5   :  { %24 = dma.hbm_to_vmem [thread:$0]  %s17_s17, 6144, %s19_s19, [#allocation3], %s1208_s23, %s1208_s23, %s1209_s24  }
   0x6   :  { %s1210_s25 = smov [#allocation5]  }
   0x7   :  { %s35_s26 = sshll.u32 %s1210_s25, 4  ;;  %s36_s26 = int_to_ptr.vmem [resolvable:$true] %s35_s26 }
   0x8   :  { %41 = dma.hbm_to_vmem [thread:$0]  %s34_s22, 6144, %s36_s26, [#allocation6], %s1208_s23, %s1208_s23, %s1209_s24  }
   0x9   :  { %1201 = dma.done.wait [#allocation3], 6144  }
   0xa   :  { %1202 = vsyncadd [#allocation3], 4294961152 }
   0xb   :  { %1203 = dma.done.wait [#allocation6], 6144  }
   0xc   :  { %1204 = vsyncadd [#allocation6], 4294961152  ;;  %v140_v0 = vld [vmem:[#allocation5 + $0x150] sm:$0xff]  ;;  %v141_v1 = vld [vmem:[#allocation5 + $0x158] sm:$0xff]  ;;  %v1211_v10 = vmov 0   ;;  %v1212_v37 = vmov 1  }
   0xd   :  { %1063 = vmatpush.xpose.msra.mxu2 %v140_v0  ;;  %1071 = vmatpush.xpose.msra.mxu3 %v141_v1  ;;  %v134_v2 = vld [vmem:[#allocation5 + $0x120] sm:$0xff]  ;;  %v135_v3 = vld [vmem:[#allocation5 + $0x128] sm:$0xff]  ;;  %v128_v4 = vld [vmem:[#allocation5 + $0xf0] sm:$0xff]  ;;  %vm442_vm1 = vcmask 523264   ;;  %s1049_s21 = sshll.u32 %s1977_s4, 4  ;;  %s1220_s22 = smov 128   ;;  %s1050_s21 = int_to_ptr.hbm [resolvable:$true] %s1049_s21 }
   0xe   :  { %154 = vmatpush.xpose.msra.mxu0 %v140_v0  ;;  %195 = vmatpush.xpose.msra.mxu1 %v141_v1  ;;  %v129_v5 = vld [vmem:[#allocation5 + $0xf8] sm:$0xff]  ;;  %v122_v6 = vld [vmem:[#allocation5 + $0xc0] sm:$0xff]  ;;  %v123_v7 = vld [vmem:[#allocation5 + $0xc8] sm:$0xff]  ;;  %s1221_s23 = smov 8  }
   0xf   :  { %v1256_v8 = vld [vmem:[%s1974_s1 + $0x10] sm:$0xff]  ;;  %v1261_v9 = vld [vmem:[%s1974_s1] sm:$0xff]  ;;  %1095 = vset.pattern.permute.xlu1 %v1211_v10  ;;  %1094 = vset.pattern.permute.xlu0 %v1211_v10  ;;  %v117_v12 = vld [vmem:[#allocation5 + $0x98] sm:$0xff] }
  0x10   :  { %409 = vperm.xlu1 %1095, %v1256_v8   ;;  %403 = vperm.xlu0 %1094, %v1261_v9   ;;  %v116_v11 = vld [vmem:[#allocation5 + $0x90] sm:$0xff]  ;;  %v110_v13 = vld [vmem:[#allocation5 + $0x60] sm:$0xff]  ;;  %v111_v14 = vld [vmem:[#allocation5 + $0x68] sm:$0xff] }
  0x11   :  { %1064 = vmatpush.xpose.msra.mxu2 %v134_v2  ;;  %1072 = vmatpush.xpose.msra.mxu3 %v135_v3  ;;  %v1271_v15 = vld [vmem:[%s1974_s1 + $0x18] sm:$0xff]  ;;  %v1276_v16 = vld [vmem:[%s1974_s1 + $0x8] sm:$0xff]  ;;  %v104_v17 = vld [vmem:[#allocation5 + $0x30] sm:$0xff] }
  0x12   :  { %155 = vmatpush.xpose.msra.mxu0 %v134_v2  ;;  %196 = vmatpush.xpose.msra.mxu1 %v135_v3  ;;  %v105_v18 = vld [vmem:[#allocation5 + $0x38] sm:$0xff]  ;;  %v98_v19 = vld [vmem:[#allocation5] sm:$0xff]  ;;  %v99_v20 = vld [vmem:[#allocation5 + $0x8] sm:$0xff] }
  0x13   :  { %1096 = vset.pattern.permute.xlu2 %v1211_v10  ;;  %v1283_v21 = vld [vmem:[%s1974_s1 + $0x38] sm:$0xff]  ;;  %v142_v22 = vld [vmem:[#allocation5 + $0x160] sm:$0xff]  ;;  %v143_v23 = vld [vmem:[#allocation5 + $0x168] sm:$0xff] }
  0x14   :  { %v1288_v24 = vld [vmem:[%s1974_s1 + $0x30] sm:$0xff]  ;;  %v74_v25 = vld [vmem:[#allocation2 + $0xc0] sm:$0xff]  ;;  %v75_v26 = vld [vmem:[#allocation2 + $0xc8] sm:$0xff] }
  0x15   :  { %1065 = vmatpush.xpose.msra.mxu2 %v128_v4  ;;  %1073 = vmatpush.xpose.msra.mxu3 %v129_v5  ;;  %v144_v27 = vld [vmem:[#allocation5 + $0x170] sm:$0xff]  ;;  %v145_v28 = vld [vmem:[#allocation5 + $0x178] sm:$0xff]  ;;  %v50_v31 = vld [vmem:[#allocation2] sm:$0xff] }
  0x16   :  { %156 = vmatpush.xpose.msra.mxu0 %v128_v4  ;;  %197 = vmatpush.xpose.msra.mxu1 %v129_v5  ;;  %v136_v29 = vld [vmem:[#allocation5 + $0x130] sm:$0xff]  ;;  %v137_v30 = vld [vmem:[#allocation5 + $0x138] sm:$0xff]  ;;  %v51_v32 = vld [vmem:[#allocation2 + $0x8] sm:$0xff] }
  0x17   :  { %v138_v33 = vld [vmem:[#allocation5 + $0x140] sm:$0xff]  ;;  %v139_v34 = vld [vmem:[#allocation5 + $0x148] sm:$0xff]  ;;  %v80_v38 = vld [vmem:[#allocation2 + $0xf0] sm:$0xff] }
  0x18   :  { %412 = vperm.xlu1 %1095, %v1271_v15   ;;  %406 = vperm.xlu0 %1094, %v1276_v16   ;;  %v130_v35 = vld [vmem:[#allocation5 + $0x100] sm:$0xff]  ;;  %v131_v36 = vld [vmem:[#allocation5 + $0x108] sm:$0xff]  ;;  %v81_v39 = vld [vmem:[#allocation2 + $0xf8] sm:$0xff] }
  0x19   :  { %1066 = vmatpush.xpose.msra.mxu2 %v122_v6  ;;  %1074 = vmatpush.xpose.msra.mxu3 %v123_v7  ;;  %v132_v40 = vld [vmem:[#allocation5 + $0x110] sm:$0xff]  ;;  %v133_v41 = vld [vmem:[#allocation5 + $0x118] sm:$0xff]  ;;  %v126_v46 = vld [vmem:[#allocation5 + $0xe0] sm:$0xff] }
  0x1a   :  { %157 = vmatpush.xpose.msra.mxu0 %v122_v6  ;;  %198 = vmatpush.xpose.msra.mxu1 %v123_v7  ;;  %v124_v42 = vld [vmem:[#allocation5 + $0xd0] sm:$0xff]  ;;  %v125_v43 = vld [vmem:[#allocation5 + $0xd8] sm:$0xff]  ;;  %v127_v47 = vld [vmem:[#allocation5 + $0xe8] sm:$0xff]  ;;  %v1213_v6 = vmov 2  }
  0x1b   :  { %v56_v44 = vld [vmem:[#allocation2 + $0x30] sm:$0xff]  ;;  %v57_v45 = vld [vmem:[#allocation2 + $0x38] sm:$0xff]  ;;  %v118_v48 = vld [vmem:[#allocation5 + $0xa0] sm:$0xff] }
  0x1c   :  { %v119_v49 = vld [vmem:[#allocation5 + $0xa8] sm:$0xff]  ;;  %v86_v50 = vld [vmem:[#allocation2 + $0x120] sm:$0xff]  ;;  %v120_v52 = vld [vmem:[#allocation5 + $0xb0] sm:$0xff] }
  0x1d   :  { %1067 = vmatpush.xpose.msra.mxu2 %v116_v11  ;;  %1075 = vmatpush.xpose.msra.mxu3 %v117_v12  ;;  %v87_v51 = vld [vmem:[#allocation2 + $0x128] sm:$0xff]  ;;  %v121_v53 = vld [vmem:[#allocation5 + $0xb8] sm:$0xff]  ;;  %v112_v54 = vld [vmem:[#allocation5 + $0x70] sm:$0xff] }
  0x1e   :  { %158 = vmatpush.xpose.msra.mxu0 %v116_v11  ;;  %199 = vmatpush.xpose.msra.mxu1 %v117_v12  ;;  %v113_v55 = vld [vmem:[#allocation5 + $0x78] sm:$0xff]  ;;  %v62_v56 = vld [vmem:[#allocation2 + $0x60] sm:$0xff]  ;;  %v63_v57 = vld [vmem:[#allocation2 + $0x68] sm:$0xff] }
  0x1f   :  { %v1301_v58 = vld [vmem:[%s1974_s1 + $0x20] sm:$0xff]  ;;  %v115_v60 = vld [vmem:[#allocation5 + $0x88] sm:$0xff]  ;;  %v92_v0 = vld [vmem:[#allocation2 + $0x150] sm:$0xff] }
  0x20   :  { %424 = vperm.xlu1 %1095, %v1283_v21   ;;  %421 = vperm.xlu0 %1094, %v1288_v24   ;;  %v114_v59 = vld [vmem:[#allocation5 + $0x80] sm:$0xff]  ;;  %v107_v62 = vld [vmem:[#allocation5 + $0x48] sm:$0xff]  ;;  %v93_v1 = vld [vmem:[#allocation2 + $0x158] sm:$0xff] }
  0x21   :  { %1068 = vmatpush.xpose.msra.mxu2 %v110_v13  ;;  %1076 = vmatpush.xpose.msra.mxu3 %v111_v14  ;;  %v106_v61 = vld [vmem:[#allocation5 + $0x40] sm:$0xff]  ;;  %v1307_v63 = vld [vmem:[%s1974_s1 + $0x28] sm:$0xff]  ;;  %v108_v2 = vld [vmem:[#allocation5 + $0x50] sm:$0xff] }
  0x22   :  { %159 = vmatpush.xpose.msra.mxu0 %v110_v13  ;;  %200 = vmatpush.xpose.msra.mxu1 %v111_v14  ;;  %v109_v3 = vld [vmem:[#allocation5 + $0x58] sm:$0xff]  ;;  %v100_v4 = vld [vmem:[#allocation5 + $0x10] sm:$0xff]  ;;  %v102_v12 = vld [vmem:[#allocation5 + $0x20] sm:$0xff] }
  0x23   :  { %415 = vperm.xlu2 %1096, %v1301_v58   ;;  %v101_v5 = vld [vmem:[#allocation5 + $0x18] sm:$0xff]  ;;  %v68_v7 = vld [vmem:[#allocation2 + $0x90] sm:$0xff]  ;;  %v103_v13 = vld [vmem:[#allocation5 + $0x28] sm:$0xff] }
  0x24   :  { %v69_v11 = vld [vmem:[#allocation2 + $0x98] sm:$0xff]  ;;  %v52_v14 = vld [vmem:[#allocation2 + $0x10] sm:$0xff] }
  0x25   :  { %1069 = vmatpush.xpose.msra.mxu2 %v104_v17  ;;  %1077 = vmatpush.xpose.msra.mxu3 %v105_v18 }
  0x26   :  { %160 = vmatpush.xpose.msra.mxu0 %v104_v17  ;;  %201 = vmatpush.xpose.msra.mxu1 %v105_v18  ;;  %v53_v17 = vld [vmem:[#allocation2 + $0x18] sm:$0xff]  ;;  %v54_v18 = vld [vmem:[#allocation2 + $0x20] sm:$0xff] }
  0x28   :  { %1098 = vset.pattern.permute.xlu1 %v1212_v37  ;;  %1097 = vset.pattern.permute.xlu0 %v1212_v37 }
  0x29   :  { %1070 = vmatpush.xpose.msra.mxu2 %v98_v19  ;;  %1078 = vmatpush.xpose.msra.mxu3 %v99_v20 }
  0x2a   :  { %161 = vmatpush.xpose.msra.mxu0 %v98_v19  ;;  %202 = vmatpush.xpose.msra.mxu1 %v99_v20  ;;  %v55_v19 = vld [vmem:[#allocation2 + $0x28] sm:$0xff]  ;;  %v58_v20 = vld [vmem:[#allocation2 + $0x40] sm:$0xff] }
  0x2b   :  { %480 = vperm.xlu1 %1098, %v1276_v16   ;;  %477 = vperm.xlu0 %1097, %v1261_v9  }
  0x2c   :  { %174 = vmatmul.f32.vlgmr.msra.gmra.mxu2 %v74_v25  ;;  %215 = vmatmul.f32.vlgmr.msra.gmra.mxu3 %v75_v26  ;;  %v61_v25 = vld [vmem:[#allocation2 + $0x58] sm:$0xff]  ;;  %v64_v26 = vld [vmem:[#allocation2 + $0x70] sm:$0xff] }
  0x2d   :  { %236 = vmatpush.xpose.msrb.mxu2 %v142_v22  ;;  %277 = vmatpush.xpose.msrb.mxu3 %v143_v23  ;;  %v59_v22 = vld [vmem:[#allocation2 + $0x48] sm:$0xff]  ;;  %v60_v23 = vld [vmem:[#allocation2 + $0x50] sm:$0xff] }
  0x2e   :  { %318 = vmatpush.xpose.msrb.mxu0 %v144_v27  ;;  %359 = vmatpush.xpose.msrb.mxu1 %v145_v28  ;;  %v65_v27 = vld [vmem:[#allocation2 + $0x78] sm:$0xff]  ;;  %v66_v28 = vld [vmem:[#allocation2 + $0x80] sm:$0xff] }
  0x2f   :  { %162 = vmatmul.f32.vlgmr.msra.gmra.mxu0 %v50_v31  ;;  %203 = vmatmul.f32.vlgmr.msra.gmra.mxu1 %v51_v32  ;;  %v71_v31 = vld [vmem:[#allocation2 + $0xa8] sm:$0xff]  ;;  %v72_v32 = vld [vmem:[#allocation2 + $0xb0] sm:$0xff] }
  0x30   :  { %418 = vperm.xlu2 %1096, %v1307_v63  }
  0x31   :  { %237 = vmatpush.xpose.msrb.mxu2 %v136_v29  ;;  %278 = vmatpush.xpose.msrb.mxu3 %v137_v30  ;;  %v67_v29 = vld [vmem:[#allocation2 + $0x88] sm:$0xff]  ;;  %v70_v30 = vld [vmem:[#allocation2 + $0xa0] sm:$0xff] }
  0x32   :  { %319 = vmatpush.xpose.msrb.mxu0 %v138_v33  ;;  %360 = vmatpush.xpose.msrb.mxu1 %v139_v34  ;;  %v73_v33 = vld [vmem:[#allocation2 + $0xb8] sm:$0xff]  ;;  %v76_v34 = vld [vmem:[#allocation2 + $0xd0] sm:$0xff] }
  0x33   :  { %486 = vperm.xlu1 %1098, %v1271_v15   ;;  %498 = vperm.xlu0 %1097, %v1283_v21  }
  0x34   :  { %177 = vmatmul.f32.gmra.mxu2 %v80_v38  ;;  %218 = vmatmul.f32.gmra.mxu3 %v81_v39  ;;  %v82_v38 = vld [vmem:[#allocation2 + $0x100] sm:$0xff]  ;;  %v83_v39 = vld [vmem:[#allocation2 + $0x108] sm:$0xff] }
  0x35   :  { %238 = vmatpush.xpose.msrb.mxu2 %v130_v35  ;;  %279 = vmatpush.xpose.msrb.mxu3 %v131_v36  ;;  %v77_v35 = vld [vmem:[#allocation2 + $0xd8] sm:$0xff]  ;;  %v78_v36 = vld [vmem:[#allocation2 + $0xe0] sm:$0xff] }
  0x36   :  { %320 = vmatpush.xpose.msrb.mxu0 %v132_v40  ;;  %361 = vmatpush.xpose.msrb.mxu1 %v133_v41  ;;  %v84_v40 = vld [vmem:[#allocation2 + $0x110] sm:$0xff]  ;;  %v85_v41 = vld [vmem:[#allocation2 + $0x118] sm:$0xff] }
  0x37   :  { %165 = vmatmul.f32.gmra.mxu0 %v56_v44  ;;  %206 = vmatmul.f32.gmra.mxu1 %v57_v45  ;;  %v90_v44 = vld [vmem:[#allocation2 + $0x140] sm:$0xff]  ;;  %v91_v45 = vld [vmem:[#allocation2 + $0x148] sm:$0xff] }
  0x38   :  { %1099 = vset.pattern.permute.xlu2 %v1212_v37  ;;  %v79_v37 = vld [vmem:[#allocation2 + $0xe8] sm:$0xff] }
  0x39   :  { %239 = vmatpush.xpose.msrb.mxu2 %v124_v42  ;;  %280 = vmatpush.xpose.msrb.mxu3 %v125_v43  ;;  %v88_v42 = vld [vmem:[#allocation2 + $0x130] sm:$0xff]  ;;  %v89_v43 = vld [vmem:[#allocation2 + $0x138] sm:$0xff] }
  0x3a   :  { %321 = vmatpush.xpose.msrb.mxu0 %v126_v46  ;;  %362 = vmatpush.xpose.msrb.mxu1 %v127_v47  ;;  %v94_v46 = vld [vmem:[#allocation2 + $0x160] sm:$0xff]  ;;  %v95_v47 = vld [vmem:[#allocation2 + $0x168] sm:$0xff] }
  0x3b   :  { %492 = vperm.xlu1 %1098, %v1307_v63   ;;  %1100 = vset.pattern.permute.xlu0 %v1213_v6 }
  0x3c   :  { %180 = vmatmul.f32.gmra.mxu2 %v86_v50  ;;  %221 = vmatmul.f32.gmra.mxu3 %v87_v51 }
  0x3d   :  { %240 = vmatpush.xpose.msrb.mxu2 %v118_v48  ;;  %281 = vmatpush.xpose.msrb.mxu3 %v119_v49  ;;  %v96_v48 = vld [vmem:[#allocation2 + $0x170] sm:$0xff]  ;;  %v97_v49 = vld [vmem:[#allocation2 + $0x178] sm:$0xff] }
  0x3e   :  { %322 = vmatpush.xpose.msrb.mxu0 %v120_v52  ;;  %363 = vmatpush.xpose.msrb.mxu1 %v121_v53 }
  0x3f   :  { %168 = vmatmul.f32.gmra.mxu0 %v62_v56  ;;  %209 = vmatmul.f32.gmra.mxu1 %v63_v57 }
  0x40   :  { %550 = vperm.xlu0 %1100, %v1261_v9   ;;  %483 = vperm.xlu2 %1099, %v1256_v8  }
  0x41   :  { %241 = vmatpush.xpose.msrb.mxu2 %v112_v54  ;;  %282 = vmatpush.xpose.msrb.mxu3 %v113_v55 }
  0x42   :  { %323 = vmatpush.xpose.msrb.mxu0 %v114_v59  ;;  %364 = vmatpush.xpose.msrb.mxu1 %v115_v60 }
  0x43   :  { %1101 = vset.pattern.permute.xlu1 %v1213_v6 }
  0x44   :  { %183 = vmatmul.f32.gmra.mxu2 %v92_v0  ;;  %224 = vmatmul.f32.gmra.mxu3 %v93_v1 }
  0x45   :  { %242 = vmatpush.xpose.msrb.mxu2 %v106_v61  ;;  %283 = vmatpush.xpose.msrb.mxu3 %v107_v62 }
  0x46   :  { %324 = vmatpush.xpose.msrb.mxu0 %v108_v2  ;;  %365 = vmatpush.xpose.msrb.mxu1 %v109_v3 }
  0x47   :  { %171 = vmatmul.f32.gmra.mxu0 %v68_v7  ;;  %212 = vmatmul.f32.gmra.mxu1 %v69_v11 }
  0x48   :  { %553 = vperm.xlu1 %1101, %v1276_v16   ;;  %571 = vperm.xlu0 %1100, %v1283_v21  }
  0x49   :  { %243 = vmatpush.xpose.msrb.mxu2 %v100_v4  ;;  %284 = vmatpush.xpose.msrb.mxu3 %v101_v5 }
  0x4a   :  { %325 = vmatpush.xpose.msrb.mxu0 %v102_v12  ;;  %366 = vmatpush.xpose.msrb.mxu1 %v103_v13 }
  0x4b   :  { %489 = vperm.xlu2 %1099, %v1301_v58  }
  0x4c   :  { %244 = vmatmul.f32.vlgmr.msrb.gmra.mxu2 %v52_v14  ;;  %285 = vmatmul.f32.vlgmr.msrb.gmra.mxu3 %v53_v17 }
  0x4f   :  { %326 = vmatmul.f32.vlgmr.msrb.gmra.mxu0 %v54_v18  ;;  %367 = vmatmul.f32.vlgmr.msrb.gmra.mxu1 %v55_v19 }
  0x50   :  { %559 = vperm.xlu1 %1101, %v1271_v15  }
  0x53   :  { %495 = vperm.xlu2 %1099, %v1288_v24  }
  0x54   :  { %247 = vmatmul.f32.gmra.mxu2 %v58_v20  ;;  %288 = vmatmul.f32.gmra.mxu3 %v59_v22 }
  0x57   :  { %329 = vmatmul.f32.gmra.mxu0 %v60_v23  ;;  %370 = vmatmul.f32.gmra.mxu1 %v61_v25 }
  0x58   :  { %565 = vperm.xlu1 %1101, %v1307_v63  }
  0x5b   :  { %1102 = vset.pattern.permute.xlu2 %v1213_v6 }
  0x5c   :  { %250 = vmatmul.f32.gmra.mxu2 %v64_v26  ;;  %291 = vmatmul.f32.gmra.mxu3 %v65_v27  ;;  %v392_v26 = vlaneseq }
  0x5d   :  { %556 = vperm.xlu2 %1102, %v1256_v8  }
  0x5f   :  { %332 = vmatmul.f32.gmra.mxu0 %v66_v28  ;;  %373 = vmatmul.f32.gmra.mxu1 %v67_v29 }
  0x64   :  { %253 = vmatmul.f32.gmra.mxu2 %v70_v30  ;;  %294 = vmatmul.f32.gmra.mxu3 %v71_v31  ;;  %v1361_v31 = vand.u32 127, %v392_v26 }
  0x65   :  { %562 = vperm.xlu2 %1102, %v1301_v58  }
  0x67   :  { %335 = vmatmul.f32.gmra.mxu0 %v72_v32  ;;  %376 = vmatmul.f32.gmra.mxu1 %v73_v33 }
  0x6c   :  { %256 = vmatmul.f32.gmra.mxu2 %v76_v34  ;;  %297 = vmatmul.f32.gmra.mxu3 %v77_v35 }
  0x6d   :  { %568 = vperm.xlu2 %1102, %v1288_v24  }
  0x6f   :  { %338 = vmatmul.f32.gmra.mxu0 %v78_v36  ;;  %379 = vmatmul.f32.gmra.mxu1 %v79_v37 }
  0x74   :  { %259 = vmatmul.f32.gmra.mxu2 %v82_v38  ;;  %300 = vmatmul.f32.gmra.mxu3 %v83_v39 }
  0x77   :  { %341 = vmatmul.f32.gmra.mxu0 %v84_v40  ;;  %382 = vmatmul.f32.gmra.mxu1 %v85_v41 }
  0x7c   :  { %262 = vmatmul.f32.gmra.mxu2 %v88_v42  ;;  %303 = vmatmul.f32.gmra.mxu3 %v89_v43 }
  0x7d   :  { %v1345_v7 = vpop.permute.xlu2 %415 }
  0x7e   :  { %vm430_vm12 = vcmp.eq.s32.totalorder %v1361_v31, %v1345_v7 }
  0x7f   :  { %344 = vmatmul.f32.gmra.mxu0 %v90_v44  ;;  %385 = vmatmul.f32.gmra.mxu1 %v91_v45 }
  0x82   :  { %v1323_v50 = vpop.permute.xlu1 %409  ;;  %v404_v51 = vpop.permute.xlu0 %403 }
  0x83   :  { %vm426_vm2 = vcmp.eq.s32.totalorder %v1361_v31, %v404_v51  ;;  %vm428_vm8 = vcmp.eq.s32.totalorder %v1361_v31, %v1323_v50 }
  0x84   :  { %265 = vmatmul.f32.gmra.mxu2 %v94_v46  ;;  %306 = vmatmul.f32.gmra.mxu3 %v95_v47 }
  0x87   :  { %347 = vmatmul.f32.gmra.mxu0 %v96_v48  ;;  %388 = vmatmul.f32.gmra.mxu1 %v97_v49 }
  0x8a   :  { %v1325_v52 = vpop.permute.xlu1 %412  ;;  %v1331_v57 = vpop.permute.xlu0 %406 }
  0x8b   :  { %v1357_v23 = vpop.permute.xlu2 %418  ;;  %vm427_vm5 = vcmp.eq.s32.totalorder %v1361_v31, %v1331_v57  ;;  %vm429_vm9 = vcmp.eq.s32.totalorder %v1361_v31, %v1325_v52 }
  0x8c   :  { %vm431_vm14 = vcmp.eq.s32.totalorder %v1361_v31, %v1357_v23  ;;  %v1214_v23 = vmov 3  }
  0x8d   :  { %1103 = vset.pattern.permute.xlu0 %v1214_v23  ;;  %1104 = vset.pattern.permute.xlu1 %v1214_v23 }
  0x8e   :  { %1105 = vset.pattern.permute.xlu2 %v1214_v23 }
  0x92   :  { %v1333_v61 = vpop.permute.xlu1 %424  ;;  %v1339_v1 = vpop.permute.xlu0 %421 }
  0x9a   :  { %v484_v44 = vpop.permute.xlu2 %483 }
  0x9b   :  { %vm502_vm7 = vcmp.eq.s32.totalorder %v1361_v31, %v484_v44 }
  0x9d   :  { %v481_v6 = vpop.permute.xlu1 %480  ;;  %v478_v11 = vpop.permute.xlu0 %477 }
  0x9e   :  { %vm500_vm0 = vcmp.eq.s32.totalorder %v1361_v31, %v478_v11  ;;  %vm501_vm4 = vcmp.eq.s32.totalorder %v1361_v31, %v481_v6 }
  0xa5   :  { %v1355_v18 = vpop.permute.xlu1 %486  ;;  %v1359_v25 = vpop.permute.xlu0 %498 }
  0xa6   :  { %vm503_vm10 = vcmp.eq.s32.totalorder %v1361_v31, %v1355_v18 }
  0xac   :  { %v163_v53 = vpop.f32.mrf.mxu0  ;;  %v204_v54 = vpop.f32.mrf.mxu1 }
  0xad   :  { %v205_v22 = vadd.f32 %v204_v54, %v163_v53  ;;  %v1366_v37 = vpop.permute.xlu1 %492 }
  0xaf   :  { %v1327_v55 = vpop.f32.mrf.mxu2  ;;  %v1329_v56 = vpop.f32.mrf.mxu3 }
  0xb2   :  { %v551_v40 = vpop.permute.xlu0 %550 }
  0xb3   :  { %vm573_vm3 = vcmp.eq.s32.totalorder %v1361_v31, %v551_v40 }
  0xb4   :  { %v166_v59 = vpop.f32.mrf.mxu0  ;;  %v207_v60 = vpop.f32.mrf.mxu1 }
  0xb5   :  { %v208_v35 = vadd.f32 %v207_v60, %v166_v59 }
  0xb7   :  { %v1335_v62 = vpop.f32.mrf.mxu2  ;;  %v1337_v0 = vpop.f32.mrf.mxu3 }
  0xb8   :  { %v220_v18 = vadd.f32 %v1337_v0, %v1335_v62 }
  0xba   :  { %v554_v26 = vpop.permute.xlu1 %553 }
  0xbb   :  { %vm574_vm6 = vcmp.eq.s32.totalorder %v1361_v31, %v554_v26 }
  0xbc   :  { %v169_v2 = vpop.f32.mrf.mxu0  ;;  %v210_v3 = vpop.f32.mrf.mxu1 }
  0xbd   :  { %v211_v53 = vadd.f32 %v210_v3, %v169_v2 }
  0xbf   :  { %v1341_v4 = vpop.f32.mrf.mxu2  ;;  %v1343_v5 = vpop.f32.mrf.mxu3 }
  0xc0   :  { %v223_v0 = vadd.f32 %v1343_v5, %v1341_v4 }
  0xc4   :  { %v1347_v12 = vpop.f32.mrf.mxu0  ;;  %v1349_v13 = vpop.f32.mrf.mxu1 }
  0xc7   :  { %v1351_v14 = vpop.f32.mrf.mxu2  ;;  %v1353_v17 = vpop.f32.mrf.mxu3 }
  0xcc   :  { %v327_v19 = vpop.f32.mrf.mxu0  ;;  %v368_v20 = vpop.f32.mrf.mxu1 }
  0xcf   :  { %v245_v27 = vpop.f32.mrf.mxu2  ;;  %v286_v28 = vpop.f32.mrf.mxu3 }
  0xd0   :  { %v246_v29 = vadd.f32 %v245_v27, %v205_v22 }
  0xd2   :  { %v287_v30 = vadd.f32 %v286_v28, %v246_v29  ;;  %v1385_v28 = vpop.permute.xlu2 %489 }
  0xd3   :  { %vm504_vm13 = vcmp.eq.s32.totalorder %v1361_v31, %v1385_v28 }
  0xd4   :  { %v328_v32 = vadd.f32 %v327_v19, %v287_v30  ;;  %v330_v33 = vpop.f32.mrf.mxu0  ;;  %v371_v34 = vpop.f32.mrf.mxu1 }
  0xd6   :  { %v1364_v36 = vadd.f32 %v368_v20, %v328_v32  ;;  %v214_v32 = vadd.f32 %v1349_v13, %v1347_v12 }
  0xd7   :  { %v248_v38 = vpop.f32.mrf.mxu2  ;;  %v289_v39 = vpop.f32.mrf.mxu3 }
  0xd8   :  { %v249_v41 = vadd.f32 %v248_v38, %v208_v35  ;;  %v508_v42 = vsel %vm500_vm0, %v1364_v36, 0.0  ;;  %v434_v43 = vsel %vm426_vm2, %v1364_v36, 0.0  ;;  %v581_v59 = vsel %vm573_vm3, %v1364_v36, 0.0 }
  0xd9   :  { %v516_v45 = vsel %vm442_vm1, %v508_v42, 0.0  ;;  %v443_v46 = vsel %vm442_vm1, %v434_v43, 0.0  ;;  %v589_v6 = vsel %vm442_vm1, %v581_v59, 0.0  ;;  %vm505_vm0 = vcmp.eq.s32.totalorder %v1361_v31, %v1366_v37 }
  0xda   :  { %v290_v47 = vadd.f32 %v289_v39, %v249_v41  ;;  %517 = vadd.xlane.f32.xlu1 %v516_v45  ;;  %444 = vadd.xlane.f32.xlu2 %v443_v46  ;;  %v217_v46 = vadd.f32 %v1329_v56, %v1327_v55  ;;  %vm432_vm2 = vcmp.eq.s32.totalorder %v1361_v31, %v1339_v1 }
  0xdc   :  { %v331_v48 = vadd.f32 %v330_v33, %v290_v47  ;;  %v333_v49 = vpop.f32.mrf.mxu0  ;;  %v374_v51 = vpop.f32.mrf.mxu1 }
  0xdd   :  { %v1403_v47 = vpop.permute.xlu2 %495 }
  0xde   :  { %v1375_v54 = vadd.f32 %v371_v34, %v331_v48 }
  0xdf   :  { %v251_v60 = vpop.f32.mrf.mxu2  ;;  %v292_v11 = vpop.f32.mrf.mxu3 }
  0xe0   :  { %v252_v19 = vadd.f32 %v251_v60, %v211_v53  ;;  %v435_v20 = vsel %vm427_vm5, %v1375_v54, 0.0  ;;  %v509_v22 = vsel %vm501_vm4, %v1375_v54, 0.0  ;;  %v582_v38 = vsel %vm574_vm6, %v1375_v54, 0.0  ;;  %v560_v53 = vpop.permute.xlu1 %559 }
  0xe1   :  { %v446_v27 = vsel %vm442_vm1, %v435_v20, 0.0  ;;  %v519_v2 = vsel %vm442_vm1, %v509_v22, 0.0  ;;  %v592_v12 = vsel %vm442_vm1, %v582_v38, 0.0  ;;  %vm576_vm11 = vcmp.eq.s32.totalorder %v1361_v31, %v560_v53 }
  0xe2   :  { %v293_v3 = vadd.f32 %v292_v11, %v252_v19  ;;  %447 = vadd.xlane.f32.xlu0 %v446_v27  ;;  %590 = vadd.xlane.f32.xlu1 %v589_v6  ;;  %vm506_vm4 = vcmp.eq.s32.totalorder %v1361_v31, %v1403_v47  ;;  %vm433_vm5 = vcmp.eq.s32.totalorder %v1361_v31, %v1333_v61 }
  0xe3   :  { %520 = vadd.xlane.f32.xlu2 %v519_v2 }
  0xe4   :  { %v334_v57 = vadd.f32 %v333_v49, %v293_v3  ;;  %v336_v29 = vpop.f32.mrf.mxu0  ;;  %v377_v30 = vpop.f32.mrf.mxu1 }
  0xe6   :  { %v1391_v33 = vadd.f32 %v374_v51, %v334_v57 }
  0xe7   :  { %v254_v34 = vpop.f32.mrf.mxu2  ;;  %v295_v35 = vpop.f32.mrf.mxu3 }
  0xe8   :  { %v255_v39 = vadd.f32 %v254_v34, %v214_v32  ;;  %v510_v40 = vsel %vm502_vm7, %v1391_v33, 0.0  ;;  %v436_v41 = vsel %vm428_vm8, %v1391_v33, 0.0  ;;  %vm507_vm8 = vcmp.eq.s32.totalorder %v1361_v31, %v1359_v25 }
  0xe9   :  { %v522_v42 = vsel %vm442_vm1, %v510_v40, 0.0  ;;  %v449_v43 = vsel %vm442_vm1, %v436_v41, 0.0 }
  0xea   :  { %v296_v44 = vadd.f32 %v295_v35, %v255_v39  ;;  %523 = vadd.xlane.f32.xlu0 %v522_v42  ;;  %450 = vadd.xlane.f32.xlu1 %v449_v43 }
  0xeb   :  { %593 = vadd.xlane.f32.xlu2 %v592_v12 }
  0xec   :  { %v337_v50 = vadd.f32 %v336_v29, %v296_v44  ;;  %v339_v13 = vpop.f32.mrf.mxu0  ;;  %v380_v45 = vpop.f32.mrf.mxu1 }
  0xed   :  { %v557_v29 = vpop.permute.xlu2 %556 }
  0xee   :  { %v1405_v48 = vadd.f32 %v377_v30, %v337_v50  ;;  %v226_v50 = vadd.f32 %v1353_v17, %v1351_v14  ;;  %vm575_vm3 = vcmp.eq.s32.totalorder %v1361_v31, %v557_v29 }
  0xef   :  { %v257_v49 = vpop.f32.mrf.mxu2  ;;  %v298_v51 = vpop.f32.mrf.mxu3 }
  0xf0   :  { %v258_v59 = vadd.f32 %v257_v49, %v217_v46  ;;  %v511_v60 = vsel %vm503_vm10, %v1405_v48, 0.0  ;;  %v437_v11 = vsel %vm429_vm9, %v1405_v48, 0.0  ;;  %v584_v26 = vsel %vm576_vm11, %v1405_v48, 0.0 }
  0xf1   :  { %v525_v55 = vsel %vm442_vm1, %v511_v60, 0.0  ;;  %v452_v56 = vsel %vm442_vm1, %v437_v11, 0.0  ;;  %v598_v30 = vsel %vm442_vm1, %v584_v26, 0.0  ;;  %vm467_vm10 = vcmp.eq.s32.totalorder %v1361_v31, 0 }
  0xf2   :  { %v299_v19 = vadd.f32 %v298_v51, %v258_v59  ;;  %526 = vadd.xlane.f32.xlu1 %v525_v55  ;;  %vm540_vm11 = vcmp.eq.s32.totalorder %v1361_v31, 1 }
  0xf3   :  { %453 = vadd.xlane.f32.xlu2 %v452_v56 }
  0xf4   :  { %v340_v52 = vadd.f32 %v339_v13, %v299_v19  ;;  %v342_v20 = vpop.f32.mrf.mxu0  ;;  %v383_v27 = vpop.f32.mrf.mxu1  ;;  %v583_v19 = vsel %vm575_vm3, %v1391_v33, 0.0 }
  0xf5   :  { %v563_v43 = vpop.permute.xlu2 %562  ;;  %v595_v26 = vsel %vm442_vm1, %v583_v19, 0.0 }
  0xf6   :  { %v1418_v22 = vadd.f32 %v380_v45, %v340_v52  ;;  %vm577_vm15 = vcmp.eq.s32.totalorder %v1361_v31, %v563_v43 }
  0xf7   :  { %v260_v6 = vpop.f32.mrf.mxu2  ;;  %v301_v2 = vpop.f32.mrf.mxu3 }
  0xf8   :  { %v261_v3 = vadd.f32 %v260_v6, %v220_v18  ;;  %v438_v57 = vsel %vm430_vm12, %v1418_v22, 0.0  ;;  %v512_v40 = vsel %vm504_vm13, %v1418_v22, 0.0  ;;  %v585_v51 = vsel %vm577_vm15, %v1418_v22, 0.0 }
  0xf9   :  { %v455_v32 = vsel %vm442_vm1, %v438_v57, 0.0  ;;  %v528_v28 = vsel %vm442_vm1, %v512_v40, 0.0  ;;  %v601_v17 = vsel %vm442_vm1, %v585_v51, 0.0  ;;  %vm613_vm12 = vcmp.eq.s32.totalorder %v1361_v31, 2 }
  0xfa   :  { %v302_v34 = vadd.f32 %v301_v2, %v261_v3  ;;  %599 = vadd.xlane.f32.xlu1 %v598_v30  ;;  %v566_v2 = vpop.permute.xlu1 %565 }
  0xfb   :  { %456 = vadd.xlane.f32.xlu2 %v455_v32  ;;  %vm578_vm7 = vcmp.eq.s32.totalorder %v1361_v31, %v566_v2  ;;  %v572_v32 = vpop.permute.xlu0 %571 }
  0xfc   :  { %v343_v62 = vadd.f32 %v342_v20, %v302_v34  ;;  %v345_v35 = vpop.f32.mrf.mxu0  ;;  %v386_v4 = vpop.f32.mrf.mxu1  ;;  %vm580_vm9 = vcmp.eq.s32.totalorder %v1361_v31, %v572_v32 }
  0xfd   :  { %v569_v20 = vpop.permute.xlu2 %568 }
  0xfe   :  { %v1430_v7 = vadd.f32 %v383_v27, %v343_v62  ;;  %vm579_vm6 = vcmp.eq.s32.totalorder %v1361_v31, %v569_v20 }
  0xff   :  { %v263_v38 = vpop.f32.mrf.mxu2  ;;  %v304_v39 = vpop.f32.mrf.mxu3 }
 0x100   :  { %v264_v41 = vadd.f32 %v263_v38, %v223_v0  ;;  %v439_v42 = vsel %vm431_vm14, %v1430_v7, 0.0  ;;  %v513_v45 = vsel %vm505_vm0, %v1430_v7, 0.0  ;;  %v586_v61 = vsel %vm578_vm7, %v1430_v7, 0.0 }
 0x101   :  { %v458_v44 = vsel %vm442_vm1, %v439_v42, 0.0  ;;  %v531_v37 = vsel %vm442_vm1, %v513_v45, 0.0  ;;  %v604_v57 = vsel %vm442_vm1, %v586_v61, 0.0 }
 0x102   :  { %v305_v5 = vadd.f32 %v304_v39, %v264_v41  ;;  %459 = vadd.xlane.f32.xlu0 %v458_v44 }
 0x103   :  { %529 = vadd.xlane.f32.xlu2 %v528_v28 }
 0x104   :  { %v346_v12 = vadd.f32 %v345_v35, %v305_v5  ;;  %v348_v11 = vpop.f32.mrf.mxu0  ;;  %v389_v1 = vpop.f32.mrf.mxu1 }
 0x106   :  { %v1443_v13 = vadd.f32 %v386_v4, %v346_v12 }
 0x107   :  { %v266_v46 = vpop.f32.mrf.mxu2  ;;  %v307_v49 = vpop.f32.mrf.mxu3 }
 0x108   :  { %v267_v53 = vadd.f32 %v266_v46, %v226_v50  ;;  %v440_v59 = vsel %vm432_vm2, %v1443_v13, 0.0  ;;  %v514_v52 = vsel %vm506_vm4, %v1443_v13, 0.0  ;;  %v587_v47 = vsel %vm579_vm6, %v1443_v13, 0.0 }
 0x109   :  { %v461_v60 = vsel %vm442_vm1, %v440_v59, 0.0  ;;  %v534_v27 = vsel %vm442_vm1, %v514_v52, 0.0  ;;  %v607_v29 = vsel %vm442_vm1, %v587_v47, 0.0  ;;  %vm686_vm6 = vcmp.eq.s32.totalorder %v1361_v31, 3 }
 0x10a   :  { %v308_v14 = vadd.f32 %v307_v49, %v267_v53  ;;  %532 = vadd.xlane.f32.xlu0 %v531_v37  ;;  %462 = vadd.xlane.f32.xlu1 %v461_v60 }
 0x10b   :  { %602 = vadd.xlane.f32.xlu2 %v601_v17 }
 0x10c   :  { %v349_v55 = vadd.f32 %v348_v11, %v308_v14 }
 0x10e   :  { %v1456_v56 = vadd.f32 %v389_v1, %v349_v55 }
 0x110   :  { %v441_v18 = vsel %vm433_vm5, %v1456_v56, 0.0  ;;  %v515_v3 = vsel %vm507_vm8, %v1456_v56, 0.0  ;;  %v588_v25 = vsel %vm580_vm9, %v1456_v56, 0.0 }
 0x111   :  { %v464_v6 = vsel %vm442_vm1, %v441_v18, 0.0  ;;  %v537_v30 = vsel %vm442_vm1, %v515_v3, 0.0  ;;  %v610_v34 = vsel %vm442_vm1, %v588_v25, 0.0 }
 0x112   :  { %596 = vadd.xlane.f32.xlu0 %v595_v26  ;;  %535 = vadd.xlane.f32.xlu1 %v534_v27 }
 0x113   :  { %465 = vadd.xlane.f32.xlu2 %v464_v6 }
 0x11a   :  { %605 = vadd.xlane.f32.xlu0 %v604_v57  ;;  %608 = vadd.xlane.f32.xlu1 %v607_v29 }
 0x11b   :  { %538 = vadd.xlane.f32.xlu2 %v537_v30  ;;  %v1215_v30 = vmov 4  }
 0x123   :  { %611 = vadd.xlane.f32.xlu2 %v610_v34 }
 0x12e   :  { %623 = vperm.xlu0 %1103, %v1261_v9  }
 0x133   :  { %626 = vperm.xlu1 %1104, %v1276_v16  }
 0x136   :  { %644 = vperm.xlu0 %1103, %v1283_v21  }
 0x13b   :  { %632 = vperm.xlu1 %1104, %v1271_v15   ;;  %629 = vperm.xlu2 %1105, %v1256_v8  }
 0x13e   :  { %1106 = vset.pattern.permute.xlu0 %v1215_v30 }
 0x143   :  { %638 = vperm.xlu1 %1104, %v1307_v63   ;;  %635 = vperm.xlu2 %1105, %v1301_v58  }
 0x14b   :  { %641 = vperm.xlu2 %1105, %v1288_v24   ;;  %1107 = vset.pattern.permute.xlu1 %v1215_v30 }
 0x14d   :  { %v518_v62 = vpop.xlane.xlu1 %517  ;;  %v445_v9 = vpop.xlane.xlu2 %444 }
 0x14e   :  { %v468_v16 = vsel %vm467_vm10, %v445_v9, 0.0 }
 0x14f   :  { %v541_v15 = vsel %vm540_vm11, %v518_v62, %v468_v16 }
 0x153   :  { %1108 = vset.pattern.permute.xlu2 %v1215_v30 }
 0x155   :  { %v448_v8 = vpop.xlane.xlu0 %447  ;;  %v591_v21 = vpop.xlane.xlu1 %590 }
 0x156   :  { %v469_v0 = vsel %vm467_vm10, %v448_v8, 0.0  ;;  %v1498_v24 = vsel %vm613_vm12, %v591_v21, %v541_v15  ;;  %v521_v35 = vpop.xlane.xlu2 %520 }
 0x157   :  { %v542_v38 = vsel %vm540_vm11, %v521_v35, %v469_v0 }
 0x15d   :  { %v524_v39 = vpop.xlane.xlu0 %523  ;;  %v451_v40 = vpop.xlane.xlu1 %450 }
 0x15e   :  { %v470_v41 = vsel %vm467_vm10, %v451_v40, 0.0  ;;  %v594_v42 = vpop.xlane.xlu2 %593 }
 0x15f   :  { %v543_v43 = vsel %vm540_vm11, %v524_v39, %v470_v41  ;;  %v1508_v44 = vsel %vm613_vm12, %v594_v42, %v542_v38 }
 0x165   :  { %v527_v4 = vpop.xlane.xlu1 %526 }
 0x166   :  { %v454_v5 = vpop.xlane.xlu2 %453 }
 0x167   :  { %v471_v28 = vsel %vm467_vm10, %v454_v5, 0.0 }
 0x168   :  { %v544_v12 = vsel %vm540_vm11, %v527_v4, %v471_v28 }
 0x16d   :  { %v600_v23 = vpop.xlane.xlu1 %599 }
 0x16e   :  { %v1516_v50 = vsel %vm613_vm12, %v600_v23, %v544_v12  ;;  %v457_v45 = vpop.xlane.xlu2 %456 }
 0x16f   :  { %v472_v49 = vsel %vm467_vm10, %v457_v45, 0.0 }
 0x175   :  { %v460_v46 = vpop.xlane.xlu0 %459 }
 0x176   :  { %v530_v51 = vpop.xlane.xlu2 %529  ;;  %v473_v59 = vsel %vm467_vm10, %v460_v46, 0.0 }
 0x177   :  { %v545_v53 = vsel %vm540_vm11, %v530_v51, %v472_v49  ;;  %v1581_v49 = vld [vmem:[%s1974_s1] sm:$0xff]  ;;  %v1587_v51 = vld [vmem:[%s1974_s1 + $0x10] sm:$0xff] }
 0x17d   :  { %v533_v37 = vpop.xlane.xlu0 %532  ;;  %v463_v60 = vpop.xlane.xlu1 %462 }
 0x17e   :  { %v546_v11 = vsel %vm540_vm11, %v533_v37, %v473_v59  ;;  %v603_v14 = vpop.xlane.xlu2 %602  ;;  %v474_v1 = vsel %vm467_vm10, %v463_v60, 0.0  ;;  %v1599_v59 = vld [vmem:[%s1974_s1 + $0x38] sm:$0xff]  ;;  %v1612_v60 = vld [vmem:[%s1974_s1 + $0x30] sm:$0xff] }
 0x17f   :  { %v1528_v17 = vsel %vm613_vm12, %v603_v14, %v545_v53  ;;  %v1593_v53 = vld [vmem:[%s1974_s1 + $0x8] sm:$0xff]  ;;  %v1606_v37 = vld [vmem:[%s1974_s1 + $0x18] sm:$0xff] }
 0x185   :  { %v597_v55 = vpop.xlane.xlu0 %596  ;;  %v536_v19 = vpop.xlane.xlu1 %535 }
 0x186   :  { %v1534_v52 = vsel %vm613_vm12, %v597_v55, %v543_v43  ;;  %v547_v20 = vsel %vm540_vm11, %v536_v19, %v474_v1  ;;  %v466_v18 = vpop.xlane.xlu2 %465 }
 0x187   :  { %v475_v6 = vsel %vm467_vm10, %v466_v18, 0.0 }
 0x18d   :  { %v606_v26 = vpop.xlane.xlu0 %605  ;;  %v609_v27 = vpop.xlane.xlu1 %608 }
 0x18e   :  { %v1542_v2 = vsel %vm613_vm12, %v606_v26, %v546_v11  ;;  %v1546_v61 = vsel %vm613_vm12, %v609_v27, %v547_v20  ;;  %v539_v47 = vpop.xlane.xlu2 %538 }
 0x18f   :  { %v548_v3 = vsel %vm540_vm11, %v539_v47, %v475_v6 }
 0x196   :  { %v612_v57 = vpop.xlane.xlu2 %611 }
 0x197   :  { %v1552_v29 = vsel %vm613_vm12, %v612_v57, %v548_v3 }
 0x19e   :  { %v630_v32 = vpop.permute.xlu2 %629 }
 0x19f   :  { %vm648_vm13 = vcmp.eq.s32.totalorder %v1361_v31, %v630_v32 }
 0x1a0   :  { %v624_v25 = vpop.permute.xlu0 %623  ;;  %v656_v34 = vsel %vm648_vm13, %v1391_v33, 0.0 }
 0x1a1   :  { %vm646_vm14 = vcmp.eq.s32.totalorder %v1361_v31, %v624_v25  ;;  %v668_v62 = vsel %vm442_vm1, %v656_v34, 0.0 }
 0x1a2   :  { %669 = vadd.xlane.f32.xlu0 %v668_v62  ;;  %v654_v9 = vsel %vm646_vm14, %v1364_v36, 0.0 }
 0x1a3   :  { %v662_v16 = vsel %vm442_vm1, %v654_v9, 0.0 }
 0x1a4   :  { %663 = vadd.xlane.f32.xlu1 %v662_v16 }
 0x1a5   :  { %v627_v15 = vpop.permute.xlu1 %626 }
 0x1a6   :  { %vm647_vm15 = vcmp.eq.s32.totalorder %v1361_v31, %v627_v15  ;;  %v636_v8 = vpop.permute.xlu2 %635 }
 0x1a7   :  { %v655_v21 = vsel %vm647_vm15, %v1375_v54, 0.0  ;;  %vm650_vm0 = vcmp.eq.s32.totalorder %v1361_v31, %v636_v8  ;;  %vm759_vm15 = vcmp.eq.s32.totalorder %v1361_v31, 4 }
 0x1a8   :  { %v665_v0 = vsel %vm442_vm1, %v655_v21, 0.0  ;;  %v658_v38 = vsel %vm650_vm0, %v1418_v22, 0.0  ;;  %v645_v39 = vpop.permute.xlu0 %644 }
 0x1a9   :  { %666 = vadd.xlane.f32.xlu2 %v665_v0  ;;  %v674_v43 = vsel %vm442_vm1, %v658_v38, 0.0  ;;  %vm653_vm3 = vcmp.eq.s32.totalorder %v1361_v31, %v645_v39 }
 0x1aa   :  { %v661_v5 = vsel %vm653_vm3, %v1456_v56, 0.0 }
 0x1ab   :  { %v683_v45 = vsel %vm442_vm1, %v661_v5, 0.0 }
 0x1ad   :  { %v633_v35 = vpop.permute.xlu1 %632 }
 0x1ae   :  { %vm649_vm2 = vcmp.eq.s32.totalorder %v1361_v31, %v633_v35  ;;  %v642_v41 = vpop.permute.xlu2 %641 }
 0x1af   :  { %v657_v40 = vsel %vm649_vm2, %v1405_v48, 0.0  ;;  %vm652_vm4 = vcmp.eq.s32.totalorder %v1361_v31, %v642_v41 }
 0x1b0   :  { %v671_v42 = vsel %vm442_vm1, %v657_v40, 0.0  ;;  %v660_v28 = vsel %vm652_vm4, %v1443_v13, 0.0 }
 0x1b1   :  { %672 = vadd.xlane.f32.xlu1 %v671_v42  ;;  %675 = vadd.xlane.f32.xlu2 %v674_v43  ;;  %v680_v46 = vsel %vm442_vm1, %v660_v28, 0.0 }
 0x1b5   :  { %v639_v4 = vpop.permute.xlu1 %638 }
 0x1b6   :  { %vm651_vm5 = vcmp.eq.s32.totalorder %v1361_v31, %v639_v4 }
 0x1b7   :  { %v659_v12 = vsel %vm651_vm5, %v1430_v7, 0.0 }
 0x1b8   :  { %v677_v23 = vsel %vm442_vm1, %v659_v12, 0.0 }
 0x1b9   :  { %678 = vadd.xlane.f32.xlu0 %v677_v23  ;;  %684 = vadd.xlane.f32.xlu2 %v683_v45 }
 0x1ba   :  { %681 = vadd.xlane.f32.xlu1 %v680_v46 }
 0x1cd   :  { %696 = vperm.xlu0 %1106, %v1581_v49  }
 0x1d1   :  { %702 = vperm.xlu2 %1108, %v1587_v51  }
 0x1d3   :  { %699 = vperm.xlu1 %1107, %v1593_v53  }
 0x1d5   :  { %717 = vperm.xlu0 %1106, %v1599_v59  }
 0x1d9   :  { %708 = vperm.xlu2 %1108, %v1301_v58  }
 0x1db   :  { %705 = vperm.xlu1 %1107, %v1606_v37  }
 0x1e1   :  { %714 = vperm.xlu2 %1108, %v1612_v60  }
 0x1e3   :  { %711 = vperm.xlu1 %1107, %v1307_v63  }
 0x215   :  { %v670_v11 = vpop.xlane.xlu0 %669 }
 0x216   :  { %v1620_v14 = vsel %vm686_vm6, %v670_v11, %v1534_v52 }
 0x217   :  { %v664_v1 = vpop.xlane.xlu1 %663 }
 0x218   :  { %v1625_v55 = vsel %vm686_vm6, %v664_v1, %v1498_v24 }
 0x21c   :  { %v667_v19 = vpop.xlane.xlu2 %666 }
 0x21d   :  { %v1630_v20 = vsel %vm686_vm6, %v667_v19, %v1508_v44 }
 0x224   :  { %v673_v18 = vpop.xlane.xlu1 %672  ;;  %v676_v26 = vpop.xlane.xlu2 %675 }
 0x225   :  { %v1635_v27 = vsel %vm686_vm6, %v673_v18, %v1516_v50  ;;  %v1640_v52 = vsel %vm686_vm6, %v676_v26, %v1528_v17 }
 0x22c   :  { %v679_v24 = vpop.xlane.xlu0 %678  ;;  %v685_v6 = vpop.xlane.xlu2 %684 }
 0x22d   :  { %v1645_v47 = vsel %vm686_vm6, %v679_v24, %v1542_v2  ;;  %v682_v44 = vpop.xlane.xlu1 %681  ;;  %v1650_v3 = vsel %vm686_vm6, %v685_v6, %v1552_v29  ;;  %v1216_v2 = vmov 5   ;;  %v1217_v24 = vmov 6  }
 0x22e   :  { %v1655_v50 = vsel %vm686_vm6, %v682_v44, %v1546_v61  ;;  %1109 = vset.pattern.permute.xlu0 %v1216_v2  ;;  %1111 = vset.pattern.permute.xlu1 %v1216_v2 }
 0x22f   :  { %1110 = vset.pattern.permute.xlu2 %v1216_v2 }
 0x234   :  { %v703_v17 = vpop.permute.xlu2 %702 }
 0x235   :  { %vm721_vm7 = vcmp.eq.s32.totalorder %v1361_v31, %v703_v17 }
 0x236   :  { %v729_v57 = vsel %vm721_vm7, %v1391_v33, 0.0 }
 0x237   :  { %v741_v30 = vsel %vm442_vm1, %v729_v57, 0.0 }
 0x238   :  { %742 = vadd.xlane.f32.xlu0 %v741_v30 }
 0x23c   :  { %v709_v29 = vpop.permute.xlu2 %708 }
 0x23d   :  { %vm723_vm9 = vcmp.eq.s32.totalorder %v1361_v31, %v709_v29 }
 0x23e   :  { %v731_v9 = vsel %vm723_vm9, %v1418_v22, 0.0  ;;  %vm832_vm9 = vcmp.eq.s32.totalorder %v1361_v31, 5 }
 0x23f   :  { %v697_v32 = vpop.permute.xlu0 %696  ;;  %v747_v8 = vsel %vm442_vm1, %v731_v9, 0.0 }
 0x240   :  { %vm719_vm8 = vcmp.eq.s32.totalorder %v1361_v31, %v697_v32 }
 0x241   :  { %v727_v25 = vsel %vm719_vm8, %v1364_v36, 0.0 }
 0x242   :  { %v735_v61 = vsel %vm442_vm1, %v727_v25, 0.0 }
 0x243   :  { %736 = vadd.xlane.f32.xlu1 %v735_v61 }
 0x244   :  { %v715_v0 = vpop.permute.xlu2 %714 }
 0x245   :  { %v700_v34 = vpop.permute.xlu1 %699  ;;  %vm725_vm13 = vcmp.eq.s32.totalorder %v1361_v31, %v715_v0 }
 0x246   :  { %vm720_vm10 = vcmp.eq.s32.totalorder %v1361_v31, %v700_v34  ;;  %v733_v42 = vsel %vm725_vm13, %v1443_v13, 0.0 }
 0x247   :  { %v728_v62 = vsel %vm720_vm10, %v1375_v54, 0.0  ;;  %v718_v15 = vpop.permute.xlu0 %717  ;;  %v753_v5 = vsel %vm442_vm1, %v733_v42, 0.0 }
 0x248   :  { %v738_v16 = vsel %vm442_vm1, %v728_v62, 0.0  ;;  %vm726_vm11 = vcmp.eq.s32.totalorder %v1361_v31, %v718_v15 }
 0x249   :  { %739 = vadd.xlane.f32.xlu2 %v738_v16  ;;  %v734_v38 = vsel %vm726_vm11, %v1456_v56, 0.0 }
 0x24a   :  { %v756_v40 = vsel %vm442_vm1, %v734_v38, 0.0 }
 0x24b   :  { %748 = vadd.xlane.f32.xlu1 %v747_v8 }
 0x24d   :  { %v706_v21 = vpop.permute.xlu1 %705 }
 0x24e   :  { %vm722_vm12 = vcmp.eq.s32.totalorder %v1361_v31, %v706_v21 }
 0x24f   :  { %v730_v35 = vsel %vm722_vm12, %v1405_v48, 0.0 }
 0x250   :  { %v744_v39 = vsel %vm442_vm1, %v730_v35, 0.0 }
 0x251   :  { %745 = vadd.xlane.f32.xlu2 %v744_v39  ;;  %v1761_v39 = vld [vmem:[%s1974_s1 + $0x20] sm:$0xff] }
 0x253   :  { %757 = vadd.xlane.f32.xlu1 %v756_v40  ;;  %v1769_v40 = vld [vmem:[%s1974_s1 + $0x28] sm:$0xff] }
 0x255   :  { %v712_v41 = vpop.permute.xlu1 %711 }
 0x256   :  { %vm724_vm14 = vcmp.eq.s32.totalorder %v1361_v31, %v712_v41 }
 0x257   :  { %v732_v43 = vsel %vm724_vm14, %v1430_v7, 0.0 }
 0x258   :  { %v750_v4 = vsel %vm442_vm1, %v732_v43, 0.0 }
 0x259   :  { %751 = vadd.xlane.f32.xlu0 %v750_v4  ;;  %754 = vadd.xlane.f32.xlu2 %v753_v5 }
 0x26c   :  { %775 = vperm.xlu1 %1111, %v1587_v51  }
 0x26d   :  { %769 = vperm.xlu0 %1109, %v1581_v49  }
 0x271   :  { %772 = vperm.xlu2 %1110, %v1593_v53  }
 0x274   :  { %781 = vperm.xlu1 %1111, %v1301_v58  }
 0x275   :  { %790 = vperm.xlu0 %1109, %v1599_v59  }
 0x279   :  { %778 = vperm.xlu2 %1110, %v1606_v37  }
 0x27c   :  { %787 = vperm.xlu1 %1111, %v1612_v60  }
 0x27d   :  { %1112 = vset.pattern.permute.xlu0 %v1217_v24 }
 0x281   :  { %784 = vperm.xlu2 %1110, %v1307_v63  }
 0x284   :  { %1114 = vset.pattern.permute.xlu1 %v1217_v24 }
 0x289   :  { %1113 = vset.pattern.permute.xlu2 %v1217_v24  ;;  %v1218_v24 = vmov 7  }
 0x2ab   :  { %v743_v28 = vpop.xlane.xlu0 %742 }
 0x2ac   :  { %v1693_v12 = vsel %vm759_vm15, %v743_v28, %v1620_v14 }
 0x2b6   :  { %v737_v23 = vpop.xlane.xlu1 %736 }
 0x2b7   :  { %v1698_v58 = vsel %vm759_vm15, %v737_v23, %v1625_v55 }
 0x2bc   :  { %v740_v45 = vpop.xlane.xlu2 %739 }
 0x2bd   :  { %v1703_v46 = vsel %vm759_vm15, %v740_v45, %v1630_v20 }
 0x2be   :  { %v749_v63 = vpop.xlane.xlu1 %748 }
 0x2bf   :  { %v1708_v11 = vsel %vm759_vm15, %v749_v63, %v1640_v52 }
 0x2c4   :  { %v746_v14 = vpop.xlane.xlu2 %745 }
 0x2c5   :  { %v1713_v1 = vsel %vm759_vm15, %v746_v14, %v1635_v27 }
 0x2c6   :  { %v758_v55 = vpop.xlane.xlu1 %757 }
 0x2c7   :  { %v1718_v19 = vsel %vm759_vm15, %v758_v55, %v1650_v3 }
 0x2cc   :  { %v752_v20 = vpop.xlane.xlu0 %751  ;;  %v755_v18 = vpop.xlane.xlu2 %754 }
 0x2cd   :  { %v1723_v26 = vsel %vm759_vm15, %v752_v20, %v1645_v47  ;;  %v1728_v52 = vsel %vm759_vm15, %v755_v18, %v1655_v50 }
 0x2d4   :  { %v773_v27 = vpop.permute.xlu2 %772 }
 0x2d5   :  { %vm793_vm0 = vcmp.eq.s32.totalorder %v1361_v31, %v773_v27 }
 0x2d6   :  { %v801_v6 = vsel %vm793_vm0, %v1375_v54, 0.0 }
 0x2d7   :  { %v811_v44 = vsel %vm442_vm1, %v801_v6, 0.0 }
 0x2d8   :  { %812 = vadd.xlane.f32.xlu1 %v811_v44 }
 0x2dc   :  { %v779_v3 = vpop.permute.xlu2 %778 }
 0x2dd   :  { %vm795_vm4 = vcmp.eq.s32.totalorder %v1361_v31, %v779_v3 }
 0x2de   :  { %v776_v47 = vpop.permute.xlu1 %775  ;;  %v803_v61 = vsel %vm795_vm4, %v1405_v48, 0.0 }
 0x2df   :  { %v770_v17 = vpop.permute.xlu0 %769  ;;  %vm794_vm2 = vcmp.eq.s32.totalorder %v1361_v31, %v776_v47  ;;  %v817_v15 = vsel %vm442_vm1, %v803_v61, 0.0 }
 0x2e0   :  { %vm792_vm3 = vcmp.eq.s32.totalorder %v1361_v31, %v770_v17  ;;  %v802_v50 = vsel %vm794_vm2, %v1391_v33, 0.0 }
 0x2e1   :  { %v814_v57 = vsel %vm442_vm1, %v802_v50, 0.0  ;;  %v800_v30 = vsel %vm792_vm3, %v1364_v36, 0.0  ;;  %vm905_vm3 = vcmp.eq.s32.totalorder %v1361_v31, 6 }
 0x2e2   :  { %815 = vadd.xlane.f32.xlu0 %v814_v57  ;;  %v808_v2 = vsel %vm442_vm1, %v800_v30, 0.0 }
 0x2e3   :  { %809 = vadd.xlane.f32.xlu2 %v808_v2 }
 0x2e4   :  { %v785_v32 = vpop.permute.xlu2 %784 }
 0x2e5   :  { %vm797_vm5 = vcmp.eq.s32.totalorder %v1361_v31, %v785_v32 }
 0x2e6   :  { %v782_v29 = vpop.permute.xlu1 %781  ;;  %v805_v25 = vsel %vm797_vm5, %v1430_v7, 0.0 }
 0x2e7   :  { %vm796_vm6 = vcmp.eq.s32.totalorder %v1361_v31, %v782_v29  ;;  %v791_v34 = vpop.permute.xlu0 %790  ;;  %v823_v16 = vsel %vm442_vm1, %v805_v25, 0.0 }
 0x2e8   :  { %v804_v62 = vsel %vm796_vm6, %v1418_v22, 0.0  ;;  %vm799_vm7 = vcmp.eq.s32.totalorder %v1361_v31, %v791_v34 }
 0x2e9   :  { %v820_v9 = vsel %vm442_vm1, %v804_v62, 0.0  ;;  %v807_v21 = vsel %vm799_vm7, %v1456_v56, 0.0 }
 0x2ea   :  { %821 = vadd.xlane.f32.xlu1 %v820_v9  ;;  %824 = vadd.xlane.f32.xlu0 %v823_v16  ;;  %v829_v35 = vsel %vm442_vm1, %v807_v21, 0.0 }
 0x2eb   :  { %818 = vadd.xlane.f32.xlu2 %v817_v15 }
 0x2ee   :  { %v788_v8 = vpop.permute.xlu1 %787 }
 0x2ef   :  { %vm798_vm8 = vcmp.eq.s32.totalorder %v1361_v31, %v788_v8 }
 0x2f0   :  { %v806_v0 = vsel %vm798_vm8, %v1443_v13, 0.0 }
 0x2f1   :  { %v826_v38 = vsel %vm442_vm1, %v806_v0, 0.0 }
 0x2f2   :  { %830 = vadd.xlane.f32.xlu1 %v829_v35 }
 0x2f3   :  { %827 = vadd.xlane.f32.xlu2 %v826_v38 }
 0x2fe   :  { %842 = vperm.xlu0 %1112, %v1581_v49  }
 0x306   :  { %863 = vperm.xlu0 %1112, %v1599_v59  }
 0x30b   :  { %848 = vperm.xlu1 %1114, %v1587_v51   ;;  %845 = vperm.xlu2 %1113, %v1593_v53  }
 0x30e   :  { %1115 = vset.pattern.permute.xlu0 %v1218_v24 }
 0x313   :  { %854 = vperm.xlu1 %1114, %v1761_v39   ;;  %851 = vperm.xlu2 %1113, %v1606_v37  }
 0x31b   :  { %860 = vperm.xlu1 %1114, %v1612_v60   ;;  %857 = vperm.xlu2 %1113, %v1769_v40  }
 0x323   :  { %1117 = vset.pattern.permute.xlu1 %v1218_v24  ;;  %1116 = vset.pattern.permute.xlu2 %v1218_v24  ;;  %v993_v24 = vld [vmem:[%s1975_s2 + $0x30] sm:$0xff] }
 0x34b   :  { %v813_v41 = vpop.xlane.xlu1 %812 }
 0x34c   :  { %v1776_v42 = vsel %vm832_vm9, %v813_v41, %v1703_v46 }
 0x355   :  { %v816_v43 = vpop.xlane.xlu0 %815 }
 0x356   :  { %v1781_v4 = vsel %vm832_vm9, %v816_v43, %v1693_v12  ;;  %v810_v5 = vpop.xlane.xlu2 %809 }
 0x357   :  { %v1786_v28 = vsel %vm832_vm9, %v810_v5, %v1698_v58 }
 0x35d   :  { %v822_v23 = vpop.xlane.xlu1 %821  ;;  %v825_v45 = vpop.xlane.xlu0 %824 }
 0x35e   :  { %v1791_v63 = vsel %vm832_vm9, %v822_v23, %v1708_v11  ;;  %v1796_v46 = vsel %vm832_vm9, %v825_v45, %v1723_v26  ;;  %v819_v12 = vpop.xlane.xlu2 %818 }
 0x35f   :  { %v1801_v14 = vsel %vm832_vm9, %v819_v12, %v1713_v1 }
 0x365   :  { %v831_v58 = vpop.xlane.xlu1 %830 }
 0x366   :  { %v1806_v55 = vsel %vm832_vm9, %v831_v58, %v1718_v19  ;;  %v828_v20 = vpop.xlane.xlu2 %827 }
 0x367   :  { %v1811_v11 = vsel %vm832_vm9, %v828_v20, %v1728_v52 }
 0x36e   :  { %v846_v18 = vpop.permute.xlu2 %845 }
 0x36f   :  { %vm866_vm10 = vcmp.eq.s32.totalorder %v1361_v31, %v846_v18 }
 0x370   :  { %v843_v26 = vpop.permute.xlu0 %842  ;;  %v874_v27 = vsel %vm866_vm10, %v1375_v54, 0.0 }
 0x371   :  { %vm865_vm11 = vcmp.eq.s32.totalorder %v1361_v31, %v843_v26  ;;  %v884_v1 = vsel %vm442_vm1, %v874_v27, 0.0 }
 0x372   :  { %885 = vadd.xlane.f32.xlu1 %v884_v1  ;;  %v873_v19 = vsel %vm865_vm11, %v1364_v36, 0.0 }
 0x373   :  { %v881_v6 = vsel %vm442_vm1, %v873_v19, 0.0 }
 0x374   :  { %882 = vadd.xlane.f32.xlu2 %v881_v6  ;;  %v990_v6 = vld [vmem:[%s1975_s2 + $0x18] sm:$0xff] }
 0x376   :  { %v852_v52 = vpop.permute.xlu2 %851 }
 0x377   :  { %vm868_vm12 = vcmp.eq.s32.totalorder %v1361_v31, %v852_v52  ;;  %v991_v52 = vld [vmem:[%s1975_s2 + $0x20] sm:$0xff] }
 0x378   :  { %v876_v44 = vsel %vm868_vm12, %v1405_v48, 0.0  ;;  %v864_v32 = vpop.permute.xlu0 %863 }
 0x379   :  { %v890_v3 = vsel %vm442_vm1, %v876_v44, 0.0  ;;  %vm872_vm0 = vcmp.eq.s32.totalorder %v1361_v31, %v864_v32  ;;  %v992_v44 = vld [vmem:[%s1975_s2 + $0x28] sm:$0xff] }
 0x37a   :  { %v880_v62 = vsel %vm872_vm0, %v1456_v56, 0.0 }
 0x37b   :  { %v902_v16 = vsel %vm442_vm1, %v880_v62, 0.0 }
 0x37c   :  { %891 = vadd.xlane.f32.xlu2 %v890_v3  ;;  %v994_v3 = vld [vmem:[%s1975_s2 + $0x38] sm:$0xff] }
 0x37d   :  { %v849_v47 = vpop.permute.xlu1 %848 }
 0x37e   :  { %vm867_vm13 = vcmp.eq.s32.totalorder %v1361_v31, %v849_v47  ;;  %v858_v17 = vpop.permute.xlu2 %857 }
 0x37f   :  { %v875_v50 = vsel %vm867_vm13, %v1391_v33, 0.0  ;;  %vm870_vm14 = vcmp.eq.s32.totalorder %v1361_v31, %v858_v17 }
 0x380   :  { %v887_v57 = vsel %vm442_vm1, %v875_v50, 0.0  ;;  %v878_v2 = vsel %vm870_vm14, %v1430_v7, 0.0 }
 0x381   :  { %888 = vadd.xlane.f32.xlu0 %v887_v57  ;;  %v896_v61 = vsel %vm442_vm1, %v878_v2, 0.0 }
 0x385   :  { %v855_v30 = vpop.permute.xlu1 %854 }
 0x386   :  { %vm869_vm15 = vcmp.eq.s32.totalorder %v1361_v31, %v855_v30 }
 0x387   :  { %v877_v29 = vsel %vm869_vm15, %v1418_v22, 0.0 }
 0x388   :  { %v893_v25 = vsel %vm442_vm1, %v877_v29, 0.0 }
 0x389   :  { %894 = vadd.xlane.f32.xlu1 %v893_v25  ;;  %897 = vadd.xlane.f32.xlu0 %v896_v61 }
 0x38d   :  { %v861_v34 = vpop.permute.xlu1 %860 }
 0x38e   :  { %vm871_vm2 = vcmp.eq.s32.totalorder %v1361_v31, %v861_v34 }
 0x38f   :  { %v879_v9 = vsel %vm871_vm2, %v1443_v13, 0.0 }
 0x390   :  { %v899_v15 = vsel %vm442_vm1, %v879_v9, 0.0 }
 0x391   :  { %903 = vadd.xlane.f32.xlu1 %v902_v16  ;;  %900 = vadd.xlane.f32.xlu2 %v899_v15 }
 0x39d   :  { %915 = vperm.xlu0 %1115, %v1581_v49  }
 0x3a5   :  { %936 = vperm.xlu0 %1115, %v1599_v59  }
 0x3a9   :  { %918 = vperm.xlu2 %1116, %v1593_v53  }
 0x3aa   :  { %921 = vperm.xlu1 %1117, %v1587_v51  }
 0x3ad   :  { %1118 = vset.pattern.permute.xlu0 %v1211_v10 }
 0x3b1   :  { %924 = vperm.xlu2 %1116, %v1606_v37  }
 0x3b2   :  { %927 = vperm.xlu1 %1117, %v1761_v39  }
 0x3b9   :  { %930 = vperm.xlu2 %1116, %v1769_v40  }
 0x3ba   :  { %933 = vperm.xlu1 %1117, %v1612_v60  }
 0x3c1   :  { %1119 = vset.pattern.permute.xlu2 %v1211_v10 }
 0x3c2   :  { %1120 = vset.pattern.permute.xlu1 %v1211_v10 }
 0x3e5   :  { %v886_v49 = vpop.xlane.xlu1 %885 }
 0x3e6   :  { %v1852_v51 = vsel %vm905_vm3, %v886_v49, %v1776_v42 }
 0x3e7   :  { %v883_v53 = vpop.xlane.xlu2 %882 }
 0x3e8   :  { %v1857_v59 = vsel %vm905_vm3, %v883_v53, %v1786_v28 }
 0x3ef   :  { %v892_v37 = vpop.xlane.xlu2 %891 }
 0x3f0   :  { %v1862_v60 = vsel %vm905_vm3, %v892_v37, %v1801_v14 }
 0x3f4   :  { %v889_v10 = vpop.xlane.xlu0 %888 }
 0x3f5   :  { %v1867_v8 = vsel %vm905_vm3, %v889_v10, %v1781_v4 }
 0x3fc   :  { %v895_v21 = vpop.xlane.xlu1 %894  ;;  %v898_v0 = vpop.xlane.xlu0 %897 }
 0x3fd   :  { %v1872_v35 = vsel %vm905_vm3, %v895_v21, %v1791_v63  ;;  %v1877_v38 = vsel %vm905_vm3, %v898_v0, %v1796_v46 }
 0x404   :  { %v904_v39 = vpop.xlane.xlu1 %903  ;;  %v901_v40 = vpop.xlane.xlu2 %900 }
 0x405   :  { %v1882_v41 = vsel %vm905_vm3, %v904_v39, %v1806_v55  ;;  %v1887_v42 = vsel %vm905_vm3, %v901_v40, %v1811_v11 }
 0x40c   :  { %v919_v43 = vpop.permute.xlu2 %918 }
 0x40d   :  { %vm939_vm4 = vcmp.eq.s32.totalorder %v1361_v31, %v919_v43 }
 0x40e   :  { %v947_v4 = vsel %vm939_vm4, %v1375_v54, 0.0 }
 0x40f   :  { %v916_v5 = vpop.permute.xlu0 %915  ;;  %v957_v28 = vsel %vm442_vm1, %v947_v4, 0.0 }
 0x410   :  { %vm938_vm5 = vcmp.eq.s32.totalorder %v1361_v31, %v916_v5  ;;  %958 = vadd.xlane.f32.xlu1 %v957_v28 }
 0x411   :  { %v946_v23 = vsel %vm938_vm5, %v1364_v36, 0.0 }
 0x412   :  { %v954_v45 = vsel %vm442_vm1, %v946_v23, 0.0 }
 0x413   :  { %955 = vadd.xlane.f32.xlu2 %v954_v45 }
 0x414   :  { %v925_v63 = vpop.permute.xlu2 %924 }
 0x415   :  { %vm941_vm6 = vcmp.eq.s32.totalorder %v1361_v31, %v925_v63 }
 0x416   :  { %v949_v46 = vsel %vm941_vm6, %v1405_v48, 0.0 }
 0x417   :  { %v963_v12 = vsel %vm442_vm1, %v949_v46, 0.0  ;;  %v937_v48 = vpop.permute.xlu0 %936 }
 0x418   :  { %vm945_vm10 = vcmp.eq.s32.totalorder %v1361_v31, %v937_v48 }
 0x419   :  { %v953_v27 = vsel %vm945_vm10, %v1456_v56, 0.0  ;;  %v989_v56 = vld [vmem:[%s1975_s2 + $0x10] sm:$0xff] }
 0x41a   :  { %v975_v1 = vsel %vm442_vm1, %v953_v27, 0.0 }
 0x41b   :  { %964 = vadd.xlane.f32.xlu2 %v963_v12 }
 0x41c   :  { %v922_v54 = vpop.permute.xlu1 %921  ;;  %v931_v14 = vpop.permute.xlu2 %930 }
 0x41d   :  { %vm940_vm7 = vcmp.eq.s32.totalorder %v1361_v31, %v922_v54  ;;  %vm943_vm8 = vcmp.eq.s32.totalorder %v1361_v31, %v931_v14 }
 0x41e   :  { %v948_v58 = vsel %vm940_vm7, %v1391_v33, 0.0  ;;  %v951_v20 = vsel %vm943_vm8, %v1430_v7, 0.0 }
 0x41f   :  { %v960_v55 = vsel %vm442_vm1, %v948_v58, 0.0  ;;  %v969_v26 = vsel %vm442_vm1, %v951_v20, 0.0 }
 0x420   :  { %961 = vadd.xlane.f32.xlu0 %v960_v55 }
 0x424   :  { %v928_v36 = vpop.permute.xlu1 %927 }
 0x425   :  { %vm942_vm9 = vcmp.eq.s32.totalorder %v1361_v31, %v928_v36 }
 0x426   :  { %v950_v11 = vsel %vm942_vm9, %v1418_v22, 0.0  ;;  %v987_v22 = vld [vmem:[%s1975_s2] sm:$0xff] }
 0x427   :  { %v966_v18 = vsel %vm442_vm1, %v950_v11, 0.0 }
 0x428   :  { %967 = vadd.xlane.f32.xlu1 %v966_v18  ;;  %970 = vadd.xlane.f32.xlu0 %v969_v26 }
 0x42c   :  { %v934_v33 = vpop.permute.xlu1 %933 }
 0x42d   :  { %vm944_vm11 = vcmp.eq.s32.totalorder %v1361_v31, %v934_v33 }
 0x42e   :  { %v952_v7 = vsel %vm944_vm11, %v1443_v13, 0.0  ;;  %v988_v13 = vld [vmem:[%s1975_s2 + $0x8] sm:$0xff]  ;;  %s1219_s2 = smov [#allocation7]  }
 0x42f   :  { %v972_v19 = vsel %vm442_vm1, %v952_v7, 0.0  ;;  %vm978_vm1 = vcmp.eq.s32.totalorder %v1361_v31, 7  ;;  %s1047_s18 = sshll.u32 %s1219_s2, 4  ;;  %s1048_s18 = int_to_ptr.vmem [resolvable:$true] %s1047_s18 }
 0x430   :  { %976 = vadd.xlane.f32.xlu1 %v975_v1  ;;  %973 = vadd.xlane.f32.xlu2 %v972_v19 }
 0x43c   :  { %996 = vperm.xlu0 %1118, %v987_v22  }
 0x444   :  { %1014 = vperm.xlu0 %1118, %v993_v24  }
 0x448   :  { %999 = vperm.xlu2 %1119, %v988_v13  }
 0x449   :  { %1002 = vperm.xlu1 %1120, %v989_v56  }
 0x450   :  { %1005 = vperm.xlu2 %1119, %v990_v6  }
 0x451   :  { %1008 = vperm.xlu1 %1120, %v991_v52  }
 0x458   :  { %1011 = vperm.xlu2 %1119, %v992_v44  }
 0x459   :  { %1017 = vperm.xlu1 %1120, %v994_v3  }
 0x483   :  { %v959_v57 = vpop.xlane.xlu1 %958 }
 0x484   :  { %v980_v25 = vsel %vm978_vm1, %v959_v57, %v1852_v51 }
 0x486   :  { %v956_v47 = vpop.xlane.xlu2 %955 }
 0x487   :  { %v979_v62 = vsel %vm978_vm1, %v956_v47, %v1857_v59 }
 0x48e   :  { %v965_v17 = vpop.xlane.xlu2 %964 }
 0x48f   :  { %v982_v49 = vsel %vm978_vm1, %v965_v17, %v1862_v60 }
 0x493   :  { %v962_v50 = vpop.xlane.xlu0 %961 }
 0x494   :  { %v981_v0 = vsel %vm978_vm1, %v962_v50, %v1867_v8 }
 0x49b   :  { %v971_v2 = vpop.xlane.xlu0 %970  ;;  %v968_v32 = vpop.xlane.xlu1 %967 }
 0x49c   :  { %v984_v60 = vsel %vm978_vm1, %v971_v2, %v1877_v38  ;;  %v983_v43 = vsel %vm978_vm1, %v968_v32, %v1872_v35 }
 0x4a3   :  { %v974_v30 = vpop.xlane.xlu2 %973  ;;  %v977_v16 = vpop.xlane.xlu1 %976 }
 0x4a4   :  { %v985_v37 = vsel %vm978_vm1, %v974_v30, %v1887_v42  ;;  %v986_v4 = vsel %vm978_vm1, %v977_v16, %v1882_v41 }
 0x4ab   :  { %v1000_v29 = vpop.permute.xlu2 %999 }
 0x4ac   :  { %vm1020_vm12 = vcmp.lt.s32.totalorder %v1361_v31, %v1000_v29 }
 0x4ad   :  { %v1028_v61 = vsel %vm1020_vm12, %v980_v25, 0.0 }
 0x4ae   :  { %1036 = vst [vmem:[#allocation7 + $0x8] sm:$0xff] %v1028_v61  ;;  %v997_v34 = vpop.permute.xlu0 %996 }
 0x4af   :  { %vm1019_vm13 = vcmp.lt.s32.totalorder %v1361_v31, %v997_v34 }
 0x4b0   :  { %v1027_v9 = vsel %vm1019_vm13, %v979_v62, 0.0 }
 0x4b1   :  { %1035 = vst [vmem:[#allocation7] sm:$0xff] %v1027_v9 }
 0x4b3   :  { %v1006_v15 = vpop.permute.xlu2 %1005 }
 0x4b4   :  { %vm1022_vm14 = vcmp.lt.s32.totalorder %v1361_v31, %v1006_v15 }
 0x4b5   :  { %v1030_v51 = vsel %vm1022_vm14, %v982_v49, 0.0 }
 0x4b6   :  { %1038 = vst [vmem:[#allocation7 + $0x18] sm:$0xff] %v1030_v51  ;;  %v1015_v53 = vpop.permute.xlu0 %1014 }
 0x4b7   :  { %vm1025_vm15 = vcmp.lt.s32.totalorder %v1361_v31, %v1015_v53 }
 0x4b8   :  { %v1033_v59 = vsel %vm1025_vm15, %v985_v37, 0.0 }
 0x4b9   :  { %1041 = vst [vmem:[#allocation7 + $0x30] sm:$0xff] %v1033_v59 }
 0x4bb   :  { %v1003_v10 = vpop.permute.xlu1 %1002  ;;  %v1012_v21 = vpop.permute.xlu2 %1011 }
 0x4bc   :  { %vm1021_vm0 = vcmp.lt.s32.totalorder %v1361_v31, %v1003_v10  ;;  %vm1024_vm2 = vcmp.lt.s32.totalorder %v1361_v31, %v1012_v21 }
 0x4bd   :  { %v1029_v39 = vsel %vm1021_vm0, %v981_v0, 0.0  ;;  %v1032_v40 = vsel %vm1024_vm2, %v984_v60, 0.0 }
 0x4be   :  { %1037 = vst [vmem:[#allocation7 + $0x10] sm:$0xff] %v1029_v39 }
 0x4bf   :  { %1040 = vst [vmem:[#allocation7 + $0x28] sm:$0xff] %v1032_v40 }
 0x4c3   :  { %v1009_v42 = vpop.permute.xlu1 %1008 }
 0x4c4   :  { %vm1023_vm3 = vcmp.lt.s32.totalorder %v1361_v31, %v1009_v42 }
 0x4c5   :  { %v1031_v8 = vsel %vm1023_vm3, %v983_v43, 0.0 }
 0x4c6   :  { %1039 = vst [vmem:[#allocation7 + $0x20] sm:$0xff] %v1031_v8 }
 0x4cb   :  { %v1018_v38 = vpop.permute.xlu1 %1017 }
 0x4cc   :  { %vm1026_vm4 = vcmp.lt.s32.totalorder %v1361_v31, %v1018_v38 }
 0x4cd   :  { %v1034_v35 = vsel %vm1026_vm4, %v986_v4, 0.0 }
 0x4ce   :  { %1042 = vst [vmem:[#allocation7 + $0x38] sm:$0xff] %v1034_v35 }
 0x4cf   :  { %1055 = dma.vmem_to_hbm [thread:$0]  %s1048_s18, 1024, %s1050_s21, [#allocation4], %s1220_s22, %s1220_s22, %s1221_s23  }
 0x4d0   :  { %1205 = dma.done.wait [#allocation4], 1024  }
 0x4d1   :  { %1206 = vsyncadd [#allocation4], 4294966272 }
 0x4d2   :  { %1060 = vsyncpa [#allocation3], 1 }
 0x4d3   :  { %1061 = vsyncpa [#allocation6], 1 }
 0x4d4   :  { %1062 = vsyncpa [#allocation4], 1 }

</bundles_post_ra>
